<compile_context>
chip_gen: v7x
topology: tpu7x:2x2x1
jax: 0.10.0
libtpu: 0.0.40
codegen_flags: <defaults>
</compile_context>

<pallas_src>
import functools

import jax
import jax.numpy as jnp
from jax.experimental import pallas as pl
from jax.experimental.pallas import tpu as pltpu

NEG_SLOPE = 0.2
BN_EPS = 1e-5


def _pick_tile(n, target=256):
    """Largest N-tile <= target that divides n and is a multiple of 8."""
    if n <= target:
        return n
    for t in range(target, 7, -1):
        if n % t == 0 and t % 8 == 0:
            return t
    return n


# ----------------------------------------------------------------------------
# Pallas kernels
# ----------------------------------------------------------------------------
def _point_conv_kernel(x_ref, wn_ref, wd_ref, p_ref, c_ref):
    """Per-point 1x1 conv (BN scale pre-folded into the weights).

    x_ref:  (TN, Cin)
    wn_ref: (Cin, Cout)   W_nbr * bn_scale
    wd_ref: (Cin, Cout)   (W_ctr - W_nbr) * bn_scale
    p_ref:  (TN, Cout)    neighbor term (to be gathered by kNN index)
    c_ref:  (TN, Cout)    center term
    """
    x = x_ref[...]
    p_ref[...] = jnp.dot(x, wn_ref[...],
                         preferred_element_type=jnp.float32).astype(p_ref.dtype)
    c_ref[...] = jnp.dot(x, wd_ref[...],
                         preferred_element_type=jnp.float32).astype(c_ref.dtype)


def _edge_reduce_kernel(pg_ref, c_ref, b_ref, o_ref):
    """max over K neighbors, then bias + LeakyReLU.

    pg_ref: (K, TN, Cout)  gathered neighbor term (K-major so the reduction
                           is a K-loop of full-vreg maxima, no XLU reduce)
    c_ref:  (TN, Cout)     center term
    b_ref:  (1, Cout)      folded BN bias
    o_ref:  (TN, Cout)
    """
    k = pg_ref.shape[0]
    m = pg_ref[0]
    for j in range(1, k):                      # K is small & static: unroll
        m = jnp.maximum(m, pg_ref[j])
    y = m + c_ref[...] + b_ref[...]
    o_ref[...] = jnp.where(y > 0, y, NEG_SLOPE * y).astype(o_ref.dtype)


def _head_kernel(x1_ref, x2_ref, x3_ref, x4_ref,
                 w1_ref, w2_ref, w3_ref, w4_ref, b_ref,
                 y_ref, idx_ref, pool_ref, m_sc, i_sc):
    """conv5 with the 512-wide concat fused, BN(+fold) + LeakyReLU, plus
    running max / argmax over the N axis carried in VMEM scratch.

    x*_ref: (TN, C_l)   per-layer point features (C_l in {64,64,128,256})
    w*_ref: (C_l, emb)  matching slices of the scale-folded conv5 weight
    b_ref:  (1, emb)
    y_ref:  (TN, emb)
    idx_ref/pool_ref: (1, emb)  written on the last N-tile
    m_sc/i_sc: (1, emb) f32/int32 running max / argmax scratch
    """
    nt = pl.program_id(1)
    tn = x1_ref.shape[0]

    @pl.when(nt == 0)
    def _():
        m_sc[...] = jnp.full_like(m_sc, -jnp.inf)
        i_sc[...] = jnp.zeros_like(i_sc)

    y = jnp.dot(x1_ref[...], w1_ref[...], preferred_element_type=jnp.float32)
    y = y + jnp.dot(x2_ref[...], w2_ref[...], preferred_element_type=jnp.float32)
    y = y + jnp.dot(x3_ref[...], w3_ref[...], preferred_element_type=jnp.float32)
    y = y + jnp.dot(x4_ref[...], w4_ref[...], preferred_element_type=jnp.float32)
    y = y + b_ref[...]
    y = jnp.where(y > 0, y, NEG_SLOPE * y)            # LeakyReLU(0.2)
    y_ref[...] = y.astype(y_ref.dtype)

    local_max = jnp.max(y, axis=0, keepdims=True)                  # (1, emb)
    rows = jax.lax.broadcasted_iota(jnp.int32, y.shape, 0) + nt * tn
    local_idx = jnp.min(
        jnp.where(y == local_max, rows, jnp.int32(2 ** 30)),
        axis=0, keepdims=True)                                     # (1, emb)

    better = local_max > m_sc[...]        # strict > keeps the lowest index
    i_sc[...] = jnp.where(better, local_idx, i_sc[...])
    m_sc[...] = jnp.maximum(m_sc[...], local_max)

    @pl.when(nt == pl.num_programs(1) - 1)
    def _():
        pool_ref[...] = m_sc[...].astype(pool_ref.dtype)
        idx_ref[...] = i_sc[...]


# ----------------------------------------------------------------------------
# Pallas wrappers
# ----------------------------------------------------------------------------
def point_conv(x, w_nbr, w_dif, tn):
    """x: (B, N, Cin) -> p, c each (B, N, Cout)."""
    b, n, cin = x.shape
    cout = w_nbr.shape[1]
    grid = (b, n // tn)
    return pl.pallas_call(
        _point_conv_kernel,
        out_shape=(
            jax.ShapeDtypeStruct((b, n, cout), jnp.float32),
            jax.ShapeDtypeStruct((b, n, cout), jnp.float32),
        ),
        grid=grid,
        in_specs=[
            pl.BlockSpec((None, tn, cin), lambda bi, ni: (bi, ni, 0)),
            pl.BlockSpec((cin, cout), lambda bi, ni: (0, 0)),
            pl.BlockSpec((cin, cout), lambda bi, ni: (0, 0)),
        ],
        out_specs=(
            pl.BlockSpec((None, tn, cout), lambda bi, ni: (bi, ni, 0)),
            pl.BlockSpec((None, tn, cout), lambda bi, ni: (bi, ni, 0)),
        ),
        compiler_params=pltpu.CompilerParams(
            dimension_semantics=("parallel", "parallel")),
    )(x, w_nbr, w_dif)


def edge_reduce(pg, c, bias, tn):
    """pg: (B, K, N, Cout), c: (B, N, Cout) -> (B, N, Cout)."""
    b, k, n, cout = pg.shape
    grid = (b, n // tn)
    return pl.pallas_call(
        _edge_reduce_kernel,
        out_shape=jax.ShapeDtypeStruct((b, n, cout), jnp.float32),
        grid=grid,
        in_specs=[
            pl.BlockSpec((None, k, tn, cout), lambda bi, ni: (bi, 0, ni, 0)),
            pl.BlockSpec((None, tn, cout), lambda bi, ni: (bi, ni, 0)),
            pl.BlockSpec((1, cout), lambda bi, ni: (0, 0)),
        ],
        out_specs=pl.BlockSpec((None, tn, cout), lambda bi, ni: (bi, ni, 0)),
        compiler_params=pltpu.CompilerParams(
            dimension_semantics=("parallel", "parallel")),
    )(pg, c, bias)


def head_conv(x1, x2, x3, x4, w5, scale, bias, tn):
    """Fused conv5 + BN + LeakyReLU + argmax / max-pool over N.

    x1..x4: (B, N, C_l); returns y (B, N, emb), idx (B, 1, emb), pool (B, 1, emb).
    """
    b, n, _ = x1.shape
    emb = w5.shape[1]
    c1, c2, c3, c4 = x1.shape[-1], x2.shape[-1], x3.shape[-1], x4.shape[-1]
    w5s = w5 * scale                               # fold BN scale into weight
    w5_1 = w5s[:c1]
    w5_2 = w5s[c1:c1 + c2]
    w5_3 = w5s[c1 + c2:c1 + c2 + c3]
    w5_4 = w5s[c1 + c2 + c3:]
    grid = (b, n // tn)
    return pl.pallas_call(
        _head_kernel,
        out_shape=(
            jax.ShapeDtypeStruct((b, n, emb), jnp.float32),
            jax.ShapeDtypeStruct((b, 1, emb), jnp.int32),
            jax.ShapeDtypeStruct((b, 1, emb), jnp.float32),
        ),
        grid=grid,
        in_specs=[
            pl.BlockSpec((None, tn, c1), lambda bi, ni: (bi, ni, 0)),
            pl.BlockSpec((None, tn, c2), lambda bi, ni: (bi, ni, 0)),
            pl.BlockSpec((None, tn, c3), lambda bi, ni: (bi, ni, 0)),
            pl.BlockSpec((None, tn, c4), lambda bi, ni: (bi, ni, 0)),
            pl.BlockSpec((c1, emb), lambda bi, ni: (0, 0)),
            pl.BlockSpec((c2, emb), lambda bi, ni: (0, 0)),
            pl.BlockSpec((c3, emb), lambda bi, ni: (0, 0)),
            pl.BlockSpec((c4, emb), lambda bi, ni: (0, 0)),
            pl.BlockSpec((1, emb), lambda bi, ni: (0, 0)),
        ],
        out_specs=(
            pl.BlockSpec((None, tn, emb), lambda bi, ni: (bi, ni, 0)),
            pl.BlockSpec((None, 1, emb), lambda bi, ni: (bi, 0, 0)),
            pl.BlockSpec((None, 1, emb), lambda bi, ni: (bi, 0, 0)),
        ),
        scratch_shapes=[
            pltpu.VMEM((1, emb), jnp.float32),
            pltpu.VMEM((1, emb), jnp.int32),
        ],
        compiler_params=pltpu.CompilerParams(
            dimension_semantics=("parallel", "arbitrary")),
    )(x1, x2, x3, x4, w5_1, w5_2, w5_3, w5_4, bias)


# ----------------------------------------------------------------------------
# JAX glue: kNN + data-dependent neighbor gather (stays outside the kernels)
# ----------------------------------------------------------------------------
def knn_idx(x, k):
    """x: (B, N, C) -> (B, N, k) nearest-neighbor indices (incl. self)."""
    xx = jnp.sum(x * x, axis=-1)                          # (B, N)
    inner = jnp.einsum("bnc,bmc->bnm", x, x)              # (B, N, N)
    pairwise = -xx[:, :, None] + 2.0 * inner - xx[:, None, :]
    _, idx = jax.lax.top_k(pairwise, k)
    return idx


def gather_neighbors(p, idx):
    """p: (B, N, C), idx: (B, N, K) -> (B, K, N, C) (K-major for the kernel)."""
    idx_t = jnp.swapaxes(idx, 1, 2)                       # (B, K, N)
    return jax.vmap(lambda pb, ib: pb[ib])(p, idx_t)      # (B, K, N, C)


def edge_conv_block(x, w, scale, bias, k, tn):
    """One DGCNN edge-conv layer with the 1x1 conv hoisted before the gather.

    x: (B, N, Cin); w: (2*Cin, Cout) (rows [0:Cin] act on nbr-ctr, rows
    [Cin:2Cin] on ctr); scale/bias: folded BN (1, Cout). Returns (B, N, Cout).
    """
    cin = x.shape[-1]
    idx = knn_idx(x, k)                                   # (B, N, K)
    w_nbr = w[:cin] * scale                               # fold BN scale
    w_dif = (w[cin:] - w[:cin]) * scale
    p, c = point_conv(x, w_nbr, w_dif, tn)                # (B, N, Cout) each
    pg = gather_neighbors(p, idx)                         # (B, K, N, Cout)
    return edge_reduce(pg, c, bias, tn)                   # (B, N, Cout)


# ----------------------------------------------------------------------------
# Parameters (deterministic synthetic init)
# ----------------------------------------------------------------------------
def init_params(key, emb_dims):
    # conv weights stored as (Cin, Cout); PyTorch Conv2d 1x1 weight is
    # (Cout, Cin, 1, 1) -> transpose of this.
    shapes = {
        "w1": (6, 64),
        "w2": (128, 64),
        "w3": (128, 128),
        "w4": (256, 256),
        "w5": (512, emb_dims),
    }
    bn_channels = {"bn1": 64, "bn2": 64, "bn3": 128, "bn4": 256, "bn5": emb_dims}
    params = {}
    keys = jax.random.split(key, len(shapes) + 2 * len(bn_channels))
    ki = 0
    for name, shp in shapes.items():
        params[name] = 0.1 * jax.random.normal(keys[ki], shp, jnp.float32)
        ki += 1
    for name, c in bn_channels.items():
        gamma = 1.0 + 0.1 * jax.random.normal(keys[ki], (c,), jnp.float32)
        ki += 1
        beta = 0.1 * jax.random.normal(keys[ki], (c,), jnp.float32)
        ki += 1
        mean = jnp.zeros((c,), jnp.float32)
        var = jnp.ones((c,), jnp.float32)
        scale = gamma / jnp.sqrt(var + BN_EPS)
        bias = beta - mean * scale
        params[name + "_scale"] = scale.reshape(1, c)
        params[name + "_bias"] = bias.reshape(1, c)
    return params


# ----------------------------------------------------------------------------
# Full forward (equivalent to DGCNN_critical.forward)
# ----------------------------------------------------------------------------
@functools.partial(jax.jit, static_argnums=(2,))
def dgcnn_critical_forward(x_bcn, params, k):
    """x_bcn: (B, 3, N) (PyTorch layout).  Returns (x, critical_index, x1)
    with x: (B, emb, N), critical_index: (B, emb) int32, x1: (B, emb)."""
    x = jnp.transpose(x_bcn, (0, 2, 1)).astype(jnp.float32)   # (B, N, 3)
    n = x.shape[1]
    tn = _pick_tile(n)   # <=256: fits v5e 16 MiB scoped / v7x 64 MiB budgets

    x1 = edge_conv_block(x, params["w1"], params["bn1_scale"],
                         params["bn1_bias"], k, tn)
    x2 = edge_conv_block(x1, params["w2"], params["bn2_scale"],
                         params["bn2_bias"], k, tn)
    x3 = edge_conv_block(x2, params["w3"], params["bn3_scale"],
                         params["bn3_bias"], k, tn)
    x4 = edge_conv_block(x3, params["w4"], params["bn4_scale"],
                         params["bn4_bias"], k, tn)

    y, idx, pool = head_conv(x1, x2, x3, x4, params["w5"],
                             params["bn5_scale"], params["bn5_bias"], tn)

    x_out = jnp.transpose(y, (0, 2, 1))                        # (B, emb, N)
    critical_index = idx[:, 0, :]                              # (B, emb)
    x1_out = pool[:, 0, :]                                     # (B, emb)
    return x_out, critical_index, x1_out


# ----------------------------------------------------------------------------
if __name__ == "__main__":
    B, N, K, EMB = 2, 16, 4, 64

    key = jax.random.PRNGKey(0)
    pkey, xkey = jax.random.split(key)
    params = init_params(pkey, EMB)
    x_in = jax.random.normal(xkey, (B, 3, N), jnp.float32)     # PyTorch (B,C,N)

    x_out, critical_index, x1_out = dgcnn_critical_forward(x_in, params, K)
    jax.block_until_ready((x_out, critical_index, x1_out))

    assert x_out.shape == (B, EMB, N)
    assert critical_index.shape == (B, EMB)
    assert x1_out.shape == (B, EMB)
    print("KERNEL_OK")
</pallas_src>

<mosaic_0001>
module attributes {stable_mosaic.version = 11 : i64} {
  func.func @_point_conv_kernel(%arg0: i32, %arg1: i32, %arg2: memref<1x16x3xf32, #tpu.memory_space<vmem>>, %arg3: memref<3x64xf32, #tpu.memory_space<vmem>>, %arg4: memref<3x64xf32, #tpu.memory_space<vmem>>, %arg5: memref<1x16x64xf32, #tpu.memory_space<vmem>>, %arg6: memref<1x16x64xf32, #tpu.memory_space<vmem>>) attributes {dimension_semantics = [#tpu.dimension_semantics<parallel>, #tpu.dimension_semantics<parallel>], iteration_bounds = array<i64: 2, 1>, scalar_prefetch = 0 : i64, scratch_operands = 0 : i64, tpu.core_type = #tpu.core_type<tc>, window_params = [{transform_indices = @transform_0, window_bounds = array<i64: 1, 16, 3>}, {pipeline_mode = #tpu.pipeline_mode<synchronous>, transform_indices = @transform_1, window_bounds = array<i64: 3, 64>}, {pipeline_mode = #tpu.pipeline_mode<synchronous>, transform_indices = @transform_2, window_bounds = array<i64: 3, 64>}, {transform_indices = @transform_3, window_bounds = array<i64: 1, 16, 64>}, {transform_indices = @transform_4, window_bounds = array<i64: 1, 16, 64>}]} {
    %c0 = arith.constant 0 : index
    %c0_0 = arith.constant 0 : index
    %c0_1 = arith.constant 0 : index
    %0 = vector.load %arg2[%c0, %c0_0, %c0_1] : memref<1x16x3xf32, #tpu.memory_space<vmem>>, vector<1x16x3xf32>
    %1 = vector.shape_cast %0 : vector<1x16x3xf32> to vector<16x3xf32>
    %c0_2 = arith.constant 0 : index
    %c0_3 = arith.constant 0 : index
    %2 = vector.load %arg3[%c0_2, %c0_3] : memref<3x64xf32, #tpu.memory_space<vmem>>, vector<3x64xf32>
    %cst = arith.constant dense<0.000000e+00> : vector<16x64xf32>
    %3 = tpu.matmul %1, %2, %cst {dimension_numbers = #tpu.dot_dimension_numbers<[1], [0], [0], [1], [0, 0, 1, 1], [], []>} : vector<16x3xf32>, vector<3x64xf32>, vector<16x64xf32> -> vector<16x64xf32>
    %c0_4 = arith.constant 0 : index
    %c0_5 = arith.constant 0 : index
    %c0_6 = arith.constant 0 : index
    %4 = vector.load %arg5[%c0_4, %c0_5, %c0_6] : memref<1x16x64xf32, #tpu.memory_space<vmem>>, vector<1x16x64xf32>
    %5 = vector.shape_cast %4 : vector<1x16x64xf32> to vector<16x64xf32>
    %6 = vector.shape_cast %3 : vector<16x64xf32> to vector<1x16x64xf32>
    tpu.vector_store %arg5[%c0_4, %c0_5, %c0_6], %6 {strides = array<i32>} : memref<1x16x64xf32, #tpu.memory_space<vmem>>, vector<1x16x64xf32>,
    %c0_7 = arith.constant 0 : index
    %c0_8 = arith.constant 0 : index
    %7 = vector.load %arg4[%c0_7, %c0_8] : memref<3x64xf32, #tpu.memory_space<vmem>>, vector<3x64xf32>
    %cst_9 = arith.constant dense<0.000000e+00> : vector<16x64xf32>
    %8 = tpu.matmul %1, %7, %cst_9 {dimension_numbers = #tpu.dot_dimension_numbers<[1], [0], [0], [1], [0, 0, 1, 1], [], []>} : vector<16x3xf32>, vector<3x64xf32>, vector<16x64xf32> -> vector<16x64xf32>
    %c0_10 = arith.constant 0 : index
    %c0_11 = arith.constant 0 : index
    %c0_12 = arith.constant 0 : index
    %9 = vector.load %arg6[%c0_10, %c0_11, %c0_12] : memref<1x16x64xf32, #tpu.memory_space<vmem>>, vector<1x16x64xf32>
    %10 = vector.shape_cast %9 : vector<1x16x64xf32> to vector<16x64xf32>
    %11 = vector.shape_cast %8 : vector<16x64xf32> to vector<1x16x64xf32>
    tpu.vector_store %arg6[%c0_10, %c0_11, %c0_12], %11 {strides = array<i32>} : memref<1x16x64xf32, #tpu.memory_space<vmem>>, vector<1x16x64xf32>,
    return
  }
  func.func @transform_0(%arg0: i32, %arg1: i32) -> (i32, i32, i32) {
    %c0_i32 = arith.constant 0 : i32
    %c0_i32_0 = arith.constant 0 : i32
    return %arg0, %arg1, %c0_i32 : i32, i32, i32
  }
  func.func @transform_1(%arg0: i32, %arg1: i32) -> (i32, i32) {
    %c0_i32 = arith.constant 0 : i32
    %c0_i32_0 = arith.constant 0 : i32
    %c0_i32_1 = arith.constant 0 : i32
    return %c0_i32, %c0_i32_0 : i32, i32
  }
  func.func @transform_2(%arg0: i32, %arg1: i32) -> (i32, i32) {
    %c0_i32 = arith.constant 0 : i32
    %c0_i32_0 = arith.constant 0 : i32
    %c0_i32_1 = arith.constant 0 : i32
    return %c0_i32, %c0_i32_0 : i32, i32
  }
  func.func @transform_3(%arg0: i32, %arg1: i32) -> (i32, i32, i32) {
    %c0_i32 = arith.constant 0 : i32
    %c0_i32_0 = arith.constant 0 : i32
    return %arg0, %arg1, %c0_i32 : i32, i32, i32
  }
  func.func @transform_4(%arg0: i32, %arg1: i32) -> (i32, i32, i32) {
    %c0_i32 = arith.constant 0 : i32
    %c0_i32_0 = arith.constant 0 : i32
    return %arg0, %arg1, %c0_i32 : i32, i32, i32
  }
}

module attributes {stable_mosaic.version = 11 : i64} {
  func.func @_edge_reduce_kernel(%arg0: i32, %arg1: i32, %arg2: memref<1x4x16x64xf32, #tpu.memory_space<vmem>>, %arg3: memref<1x16x64xf32, #tpu.memory_space<vmem>>, %arg4: memref<1x64xf32, #tpu.memory_space<vmem>>, %arg5: memref<1x16x64xf32, #tpu.memory_space<vmem>>) attributes {dimension_semantics = [#tpu.dimension_semantics<parallel>, #tpu.dimension_semantics<parallel>], iteration_bounds = array<i64: 2, 1>, scalar_prefetch = 0 : i64, scratch_operands = 0 : i64, tpu.core_type = #tpu.core_type<tc>, window_params = [{transform_indices = @transform_0, window_bounds = array<i64: 1, 4, 16, 64>}, {transform_indices = @transform_1, window_bounds = array<i64: 1, 16, 64>}, {pipeline_mode = #tpu.pipeline_mode<synchronous>, transform_indices = @transform_2, window_bounds = array<i64: 1, 64>}, {transform_indices = @transform_3, window_bounds = array<i64: 1, 16, 64>}]} {
    %c0 = arith.constant 0 : index
    %c0_0 = arith.constant 0 : index
    %c0_1 = arith.constant 0 : index
    %c0_2 = arith.constant 0 : index
    %0 = vector.load %arg2[%c0, %c0_0, %c0_1, %c0_2] : memref<1x4x16x64xf32, #tpu.memory_space<vmem>>, vector<1x1x16x64xf32>
    %1 = vector.shape_cast %0 : vector<1x1x16x64xf32> to vector<16x64xf32>
    %c0_3 = arith.constant 0 : index
    %c1 = arith.constant 1 : index
    %c0_4 = arith.constant 0 : index
    %c0_5 = arith.constant 0 : index
    %2 = vector.load %arg2[%c0_3, %c1, %c0_4, %c0_5] : memref<1x4x16x64xf32, #tpu.memory_space<vmem>>, vector<1x1x16x64xf32>
    %3 = vector.shape_cast %2 : vector<1x1x16x64xf32> to vector<16x64xf32>
    %4 = arith.maximumf %1, %3 : vector<16x64xf32>
    %c0_6 = arith.constant 0 : index
    %c2 = arith.constant 2 : index
    %c0_7 = arith.constant 0 : index
    %c0_8 = arith.constant 0 : index
    %5 = vector.load %arg2[%c0_6, %c2, %c0_7, %c0_8] : memref<1x4x16x64xf32, #tpu.memory_space<vmem>>, vector<1x1x16x64xf32>
    %6 = vector.shape_cast %5 : vector<1x1x16x64xf32> to vector<16x64xf32>
    %7 = arith.maximumf %4, %6 : vector<16x64xf32>
    %c0_9 = arith.constant 0 : index
    %c3 = arith.constant 3 : index
    %c0_10 = arith.constant 0 : index
    %c0_11 = arith.constant 0 : index
    %8 = vector.load %arg2[%c0_9, %c3, %c0_10, %c0_11] : memref<1x4x16x64xf32, #tpu.memory_space<vmem>>, vector<1x1x16x64xf32>
    %9 = vector.shape_cast %8 : vector<1x1x16x64xf32> to vector<16x64xf32>
    %10 = arith.maximumf %7, %9 : vector<16x64xf32>
    %c0_12 = arith.constant 0 : index
    %c0_13 = arith.constant 0 : index
    %c0_14 = arith.constant 0 : index
    %11 = vector.load %arg3[%c0_12, %c0_13, %c0_14] : memref<1x16x64xf32, #tpu.memory_space<vmem>>, vector<1x16x64xf32>
    %12 = vector.shape_cast %11 : vector<1x16x64xf32> to vector<16x64xf32>
    %13 = arith.addf %10, %12 : vector<16x64xf32>
    %c0_15 = arith.constant 0 : index
    %c0_16 = arith.constant 0 : index
    %14 = vector.load %arg4[%c0_15, %c0_16] : memref<1x64xf32, #tpu.memory_space<vmem>>, vector<1x64xf32>
    %15 = vector.broadcast %14 : vector<1x64xf32> to vector<16x64xf32>
    %16 = arith.addf %13, %15 : vector<16x64xf32>
    %cst = arith.constant 0.000000e+00 : f32
    %17 = vector.broadcast %cst : f32 to vector<16x64xf32>
    %18 = arith.cmpf ogt, %16, %17 : vector<16x64xf32>
    %cst_17 = arith.constant 2.000000e-01 : f32
    %19 = vector.broadcast %cst_17 : f32 to vector<16x64xf32>
    %20 = arith.mulf %19, %16 : vector<16x64xf32>
    %21 = arith.select %18, %16, %20 : vector<16x64xi1>, vector<16x64xf32>
    %c0_18 = arith.constant 0 : index
    %c0_19 = arith.constant 0 : index
    %c0_20 = arith.constant 0 : index
    %22 = vector.load %arg5[%c0_18, %c0_19, %c0_20] : memref<1x16x64xf32, #tpu.memory_space<vmem>>, vector<1x16x64xf32>
    %23 = vector.shape_cast %22 : vector<1x16x64xf32> to vector<16x64xf32>
    %24 = vector.shape_cast %21 : vector<16x64xf32> to vector<1x16x64xf32>
    tpu.vector_store %arg5[%c0_18, %c0_19, %c0_20], %24 {strides = array<i32>} : memref<1x16x64xf32, #tpu.memory_space<vmem>>, vector<1x16x64xf32>,
    return
  }
  func.func @transform_0(%arg0: i32, %arg1: i32) -> (i32, i32, i32, i32) {
    %c0_i32 = arith.constant 0 : i32
    %c0_i32_0 = arith.constant 0 : i32
    %c0_i32_1 = arith.constant 0 : i32
    return %arg0, %c0_i32, %arg1, %c0_i32_0 : i32, i32, i32, i32
  }
  func.func @transform_1(%arg0: i32, %arg1: i32) -> (i32, i32, i32) {
    %c0_i32 = arith.constant 0 : i32
    %c0_i32_0 = arith.constant 0 : i32
    return %arg0, %arg1, %c0_i32 : i32, i32, i32
  }
  func.func @transform_2(%arg0: i32, %arg1: i32) -> (i32, i32) {
    %c0_i32 = arith.constant 0 : i32
    %c0_i32_0 = arith.constant 0 : i32
    %c0_i32_1 = arith.constant 0 : i32
    return %c0_i32, %c0_i32_0 : i32, i32
  }
  func.func @transform_3(%arg0: i32, %arg1: i32) -> (i32, i32, i32) {
    %c0_i32 = arith.constant 0 : i32
    %c0_i32_0 = arith.constant 0 : i32
    return %arg0, %arg1, %c0_i32 : i32, i32, i32
  }
}

module attributes {stable_mosaic.version = 11 : i64} {
  func.func @_point_conv_kernel(%arg0: i32, %arg1: i32, %arg2: memref<1x16x64xf32, #tpu.memory_space<vmem>>, %arg3: memref<64x64xf32, #tpu.memory_space<vmem>>, %arg4: memref<64x64xf32, #tpu.memory_space<vmem>>, %arg5: memref<1x16x64xf32, #tpu.memory_space<vmem>>, %arg6: memref<1x16x64xf32, #tpu.memory_space<vmem>>) attributes {dimension_semantics = [#tpu.dimension_semantics<parallel>, #tpu.dimension_semantics<parallel>], iteration_bounds = array<i64: 2, 1>, scalar_prefetch = 0 : i64, scratch_operands = 0 : i64, tpu.core_type = #tpu.core_type<tc>, window_params = [{transform_indices = @transform_0, window_bounds = array<i64: 1, 16, 64>}, {pipeline_mode = #tpu.pipeline_mode<synchronous>, transform_indices = @transform_1, window_bounds = array<i64: 64, 64>}, {pipeline_mode = #tpu.pipeline_mode<synchronous>, transform_indices = @transform_2, window_bounds = array<i64: 64, 64>}, {transform_indices = @transform_3, window_bounds = array<i64: 1, 16, 64>}, {transform_indices = @transform_4, window_bounds = array<i64: 1, 16, 64>}]} {
    %c0 = arith.constant 0 : index
    %c0_0 = arith.constant 0 : index
    %c0_1 = arith.constant 0 : index
    %0 = vector.load %arg2[%c0, %c0_0, %c0_1] : memref<1x16x64xf32, #tpu.memory_space<vmem>>, vector<1x16x64xf32>
    %1 = vector.shape_cast %0 : vector<1x16x64xf32> to vector<16x64xf32>
    %c0_2 = arith.constant 0 : index
    %c0_3 = arith.constant 0 : index
    %2 = vector.load %arg3[%c0_2, %c0_3] : memref<64x64xf32, #tpu.memory_space<vmem>>, vector<64x64xf32>
    %cst = arith.constant dense<0.000000e+00> : vector<16x64xf32>
    %3 = tpu.matmul %1, %2, %cst {dimension_numbers = #tpu.dot_dimension_numbers<[1], [0], [0], [1], [0, 0, 1, 1], [], []>} : vector<16x64xf32>, vector<64x64xf32>, vector<16x64xf32> -> vector<16x64xf32>
    %c0_4 = arith.constant 0 : index
    %c0_5 = arith.constant 0 : index
    %c0_6 = arith.constant 0 : index
    %4 = vector.load %arg5[%c0_4, %c0_5, %c0_6] : memref<1x16x64xf32, #tpu.memory_space<vmem>>, vector<1x16x64xf32>
    %5 = vector.shape_cast %4 : vector<1x16x64xf32> to vector<16x64xf32>
    %6 = vector.shape_cast %3 : vector<16x64xf32> to vector<1x16x64xf32>
    tpu.vector_store %arg5[%c0_4, %c0_5, %c0_6], %6 {strides = array<i32>} : memref<1x16x64xf32, #tpu.memory_space<vmem>>, vector<1x16x64xf32>,
    %c0_7 = arith.constant 0 : index
    %c0_8 = arith.constant 0 : index
    %7 = vector.load %arg4[%c0_7, %c0_8] : memref<64x64xf32, #tpu.memory_space<vmem>>, vector<64x64xf32>
    %cst_9 = arith.constant dense<0.000000e+00> : vector<16x64xf32>
    %8 = tpu.matmul %1, %7, %cst_9 {dimension_numbers = #tpu.dot_dimension_numbers<[1], [0], [0], [1], [0, 0, 1, 1], [], []>} : vector<16x64xf32>, vector<64x64xf32>, vector<16x64xf32> -> vector<16x64xf32>
    %c0_10 = arith.constant 0 : index
    %c0_11 = arith.constant 0 : index
    %c0_12 = arith.constant 0 : index
    %9 = vector.load %arg6[%c0_10, %c0_11, %c0_12] : memref<1x16x64xf32, #tpu.memory_space<vmem>>, vector<1x16x64xf32>
    %10 = vector.shape_cast %9 : vector<1x16x64xf32> to vector<16x64xf32>
    %11 = vector.shape_cast %8 : vector<16x64xf32> to vector<1x16x64xf32>
    tpu.vector_store %arg6[%c0_10, %c0_11, %c0_12], %11 {strides = array<i32>} : memref<1x16x64xf32, #tpu.memory_space<vmem>>, vector<1x16x64xf32>,
    return
  }
  func.func @transform_0(%arg0: i32, %arg1: i32) -> (i32, i32, i32) {
    %c0_i32 = arith.constant 0 : i32
    %c0_i32_0 = arith.constant 0 : i32
    return %arg0, %arg1, %c0_i32 : i32, i32, i32
  }
  func.func @transform_1(%arg0: i32, %arg1: i32) -> (i32, i32) {
    %c0_i32 = arith.constant 0 : i32
    %c0_i32_0 = arith.constant 0 : i32
    %c0_i32_1 = arith.constant 0 : i32
    return %c0_i32, %c0_i32_0 : i32, i32
  }
  func.func @transform_2(%arg0: i32, %arg1: i32) -> (i32, i32) {
    %c0_i32 = arith.constant 0 : i32
    %c0_i32_0 = arith.constant 0 : i32
    %c0_i32_1 = arith.constant 0 : i32
    return %c0_i32, %c0_i32_0 : i32, i32
  }
  func.func @transform_3(%arg0: i32, %arg1: i32) -> (i32, i32, i32) {
    %c0_i32 = arith.constant 0 : i32
    %c0_i32_0 = arith.constant 0 : i32
    return %arg0, %arg1, %c0_i32 : i32, i32, i32
  }
  func.func @transform_4(%arg0: i32, %arg1: i32) -> (i32, i32, i32) {
    %c0_i32 = arith.constant 0 : i32
    %c0_i32_0 = arith.constant 0 : i32
    return %arg0, %arg1, %c0_i32 : i32, i32, i32
  }
}

module attributes {stable_mosaic.version = 11 : i64} {
  func.func @_point_conv_kernel(%arg0: i32, %arg1: i32, %arg2: memref<1x16x64xf32, #tpu.memory_space<vmem>>, %arg3: memref<64x128xf32, #tpu.memory_space<vmem>>, %arg4: memref<64x128xf32, #tpu.memory_space<vmem>>, %arg5: memref<1x16x128xf32, #tpu.memory_space<vmem>>, %arg6: memref<1x16x128xf32, #tpu.memory_space<vmem>>) attributes {dimension_semantics = [#tpu.dimension_semantics<parallel>, #tpu.dimension_semantics<parallel>], iteration_bounds = array<i64: 2, 1>, scalar_prefetch = 0 : i64, scratch_operands = 0 : i64, tpu.core_type = #tpu.core_type<tc>, window_params = [{transform_indices = @transform_0, window_bounds = array<i64: 1, 16, 64>}, {pipeline_mode = #tpu.pipeline_mode<synchronous>, transform_indices = @transform_1, window_bounds = array<i64: 64, 128>}, {pipeline_mode = #tpu.pipeline_mode<synchronous>, transform_indices = @transform_2, window_bounds = array<i64: 64, 128>}, {transform_indices = @transform_3, window_bounds = array<i64: 1, 16, 128>}, {transform_indices = @transform_4, window_bounds = array<i64: 1, 16, 128>}]} {
    %c0 = arith.constant 0 : index
    %c0_0 = arith.constant 0 : index
    %c0_1 = arith.constant 0 : index
    %0 = vector.load %arg2[%c0, %c0_0, %c0_1] : memref<1x16x64xf32, #tpu.memory_space<vmem>>, vector<1x16x64xf32>
    %1 = vector.shape_cast %0 : vector<1x16x64xf32> to vector<16x64xf32>
    %c0_2 = arith.constant 0 : index
    %c0_3 = arith.constant 0 : index
    %2 = vector.load %arg3[%c0_2, %c0_3] : memref<64x128xf32, #tpu.memory_space<vmem>>, vector<64x128xf32>
    %cst = arith.constant dense<0.000000e+00> : vector<16x128xf32>
    %3 = tpu.matmul %1, %2, %cst {dimension_numbers = #tpu.dot_dimension_numbers<[1], [0], [0], [1], [0, 0, 1, 1], [], []>} : vector<16x64xf32>, vector<64x128xf32>, vector<16x128xf32> -> vector<16x128xf32>
    %c0_4 = arith.constant 0 : index
    %c0_5 = arith.constant 0 : index
    %c0_6 = arith.constant 0 : index
    %4 = vector.load %arg5[%c0_4, %c0_5, %c0_6] : memref<1x16x128xf32, #tpu.memory_space<vmem>>, vector<1x16x128xf32>
    %5 = vector.shape_cast %4 : vector<1x16x128xf32> to vector<16x128xf32>
    %6 = vector.shape_cast %3 : vector<16x128xf32> to vector<1x16x128xf32>
    tpu.vector_store %arg5[%c0_4, %c0_5, %c0_6], %6 {strides = array<i32>} : memref<1x16x128xf32, #tpu.memory_space<vmem>>, vector<1x16x128xf32>,
    %c0_7 = arith.constant 0 : index
    %c0_8 = arith.constant 0 : index
    %7 = vector.load %arg4[%c0_7, %c0_8] : memref<64x128xf32, #tpu.memory_space<vmem>>, vector<64x128xf32>
    %cst_9 = arith.constant dense<0.000000e+00> : vector<16x128xf32>
    %8 = tpu.matmul %1, %7, %cst_9 {dimension_numbers = #tpu.dot_dimension_numbers<[1], [0], [0], [1], [0, 0, 1, 1], [], []>} : vector<16x64xf32>, vector<64x128xf32>, vector<16x128xf32> -> vector<16x128xf32>
    %c0_10 = arith.constant 0 : index
    %c0_11 = arith.constant 0 : index
    %c0_12 = arith.constant 0 : index
    %9 = vector.load %arg6[%c0_10, %c0_11, %c0_12] : memref<1x16x128xf32, #tpu.memory_space<vmem>>, vector<1x16x128xf32>
    %10 = vector.shape_cast %9 : vector<1x16x128xf32> to vector<16x128xf32>
    %11 = vector.shape_cast %8 : vector<16x128xf32> to vector<1x16x128xf32>
    tpu.vector_store %arg6[%c0_10, %c0_11, %c0_12], %11 {strides = array<i32>} : memref<1x16x128xf32, #tpu.memory_space<vmem>>, vector<1x16x128xf32>,
    return
  }
  func.func @transform_0(%arg0: i32, %arg1: i32) -> (i32, i32, i32) {
    %c0_i32 = arith.constant 0 : i32
    %c0_i32_0 = arith.constant 0 : i32
    return %arg0, %arg1, %c0_i32 : i32, i32, i32
  }
  func.func @transform_1(%arg0: i32, %arg1: i32) -> (i32, i32) {
    %c0_i32 = arith.constant 0 : i32
    %c0_i32_0 = arith.constant 0 : i32
    %c0_i32_1 = arith.constant 0 : i32
    return %c0_i32, %c0_i32_0 : i32, i32
  }
  func.func @transform_2(%arg0: i32, %arg1: i32) -> (i32, i32) {
    %c0_i32 = arith.constant 0 : i32
    %c0_i32_0 = arith.constant 0 : i32
    %c0_i32_1 = arith.constant 0 : i32
    return %c0_i32, %c0_i32_0 : i32, i32
  }
  func.func @transform_3(%arg0: i32, %arg1: i32) -> (i32, i32, i32) {
    %c0_i32 = arith.constant 0 : i32
    %c0_i32_0 = arith.constant 0 : i32
    return %arg0, %arg1, %c0_i32 : i32, i32, i32
  }
  func.func @transform_4(%arg0: i32, %arg1: i32) -> (i32, i32, i32) {
    %c0_i32 = arith.constant 0 : i32
    %c0_i32_0 = arith.constant 0 : i32
    return %arg0, %arg1, %c0_i32 : i32, i32, i32
  }
}

module attributes {stable_mosaic.version = 11 : i64} {
  func.func @_edge_reduce_kernel(%arg0: i32, %arg1: i32, %arg2: memref<1x4x16x128xf32, #tpu.memory_space<vmem>>, %arg3: memref<1x16x128xf32, #tpu.memory_space<vmem>>, %arg4: memref<1x128xf32, #tpu.memory_space<vmem>>, %arg5: memref<1x16x128xf32, #tpu.memory_space<vmem>>) attributes {dimension_semantics = [#tpu.dimension_semantics<parallel>, #tpu.dimension_semantics<parallel>], iteration_bounds = array<i64: 2, 1>, scalar_prefetch = 0 : i64, scratch_operands = 0 : i64, tpu.core_type = #tpu.core_type<tc>, window_params = [{transform_indices = @transform_0, window_bounds = array<i64: 1, 4, 16, 128>}, {transform_indices = @transform_1, window_bounds = array<i64: 1, 16, 128>}, {pipeline_mode = #tpu.pipeline_mode<synchronous>, transform_indices = @transform_2, window_bounds = array<i64: 1, 128>}, {transform_indices = @transform_3, window_bounds = array<i64: 1, 16, 128>}]} {
    %c0 = arith.constant 0 : index
    %c0_0 = arith.constant 0 : index
    %c0_1 = arith.constant 0 : index
    %c0_2 = arith.constant 0 : index
    %0 = vector.load %arg2[%c0, %c0_0, %c0_1, %c0_2] : memref<1x4x16x128xf32, #tpu.memory_space<vmem>>, vector<1x1x16x128xf32>
    %1 = vector.shape_cast %0 : vector<1x1x16x128xf32> to vector<16x128xf32>
    %c0_3 = arith.constant 0 : index
    %c1 = arith.constant 1 : index
    %c0_4 = arith.constant 0 : index
    %c0_5 = arith.constant 0 : index
    %2 = vector.load %arg2[%c0_3, %c1, %c0_4, %c0_5] : memref<1x4x16x128xf32, #tpu.memory_space<vmem>>, vector<1x1x16x128xf32>
    %3 = vector.shape_cast %2 : vector<1x1x16x128xf32> to vector<16x128xf32>
    %4 = arith.maximumf %1, %3 : vector<16x128xf32>
    %c0_6 = arith.constant 0 : index
    %c2 = arith.constant 2 : index
    %c0_7 = arith.constant 0 : index
    %c0_8 = arith.constant 0 : index
    %5 = vector.load %arg2[%c0_6, %c2, %c0_7, %c0_8] : memref<1x4x16x128xf32, #tpu.memory_space<vmem>>, vector<1x1x16x128xf32>
    %6 = vector.shape_cast %5 : vector<1x1x16x128xf32> to vector<16x128xf32>
    %7 = arith.maximumf %4, %6 : vector<16x128xf32>
    %c0_9 = arith.constant 0 : index
    %c3 = arith.constant 3 : index
    %c0_10 = arith.constant 0 : index
    %c0_11 = arith.constant 0 : index
    %8 = vector.load %arg2[%c0_9, %c3, %c0_10, %c0_11] : memref<1x4x16x128xf32, #tpu.memory_space<vmem>>, vector<1x1x16x128xf32>
    %9 = vector.shape_cast %8 : vector<1x1x16x128xf32> to vector<16x128xf32>
    %10 = arith.maximumf %7, %9 : vector<16x128xf32>
    %c0_12 = arith.constant 0 : index
    %c0_13 = arith.constant 0 : index
    %c0_14 = arith.constant 0 : index
    %11 = vector.load %arg3[%c0_12, %c0_13, %c0_14] : memref<1x16x128xf32, #tpu.memory_space<vmem>>, vector<1x16x128xf32>
    %12 = vector.shape_cast %11 : vector<1x16x128xf32> to vector<16x128xf32>
    %13 = arith.addf %10, %12 : vector<16x128xf32>
    %c0_15 = arith.constant 0 : index
    %c0_16 = arith.constant 0 : index
    %14 = vector.load %arg4[%c0_15, %c0_16] : memref<1x128xf32, #tpu.memory_space<vmem>>, vector<1x128xf32>
    %15 = vector.broadcast %14 : vector<1x128xf32> to vector<16x128xf32>
    %16 = arith.addf %13, %15 : vector<16x128xf32>
    %cst = arith.constant 0.000000e+00 : f32
    %17 = vector.broadcast %cst : f32 to vector<16x128xf32>
    %18 = arith.cmpf ogt, %16, %17 : vector<16x128xf32>
    %cst_17 = arith.constant 2.000000e-01 : f32
    %19 = vector.broadcast %cst_17 : f32 to vector<16x128xf32>
    %20 = arith.mulf %19, %16 : vector<16x128xf32>
    %21 = arith.select %18, %16, %20 : vector<16x128xi1>, vector<16x128xf32>
    %c0_18 = arith.constant 0 : index
    %c0_19 = arith.constant 0 : index
    %c0_20 = arith.constant 0 : index
    %22 = vector.load %arg5[%c0_18, %c0_19, %c0_20] : memref<1x16x128xf32, #tpu.memory_space<vmem>>, vector<1x16x128xf32>
    %23 = vector.shape_cast %22 : vector<1x16x128xf32> to vector<16x128xf32>
    %24 = vector.shape_cast %21 : vector<16x128xf32> to vector<1x16x128xf32>
    tpu.vector_store %arg5[%c0_18, %c0_19, %c0_20], %24 {strides = array<i32>} : memref<1x16x128xf32, #tpu.memory_space<vmem>>, vector<1x16x128xf32>,
    return
  }
  func.func @transform_0(%arg0: i32, %arg1: i32) -> (i32, i32, i32, i32) {
    %c0_i32 = arith.constant 0 : i32
    %c0_i32_0 = arith.constant 0 : i32
    %c0_i32_1 = arith.constant 0 : i32
    return %arg0, %c0_i32, %arg1, %c0_i32_0 : i32, i32, i32, i32
  }
  func.func @transform_1(%arg0: i32, %arg1: i32) -> (i32, i32, i32) {
    %c0_i32 = arith.constant 0 : i32
    %c0_i32_0 = arith.constant 0 : i32
    return %arg0, %arg1, %c0_i32 : i32, i32, i32
  }
  func.func @transform_2(%arg0: i32, %arg1: i32) -> (i32, i32) {
    %c0_i32 = arith.constant 0 : i32
    %c0_i32_0 = arith.constant 0 : i32
    %c0_i32_1 = arith.constant 0 : i32
    return %c0_i32, %c0_i32_0 : i32, i32
  }
  func.func @transform_3(%arg0: i32, %arg1: i32) -> (i32, i32, i32) {
    %c0_i32 = arith.constant 0 : i32
    %c0_i32_0 = arith.constant 0 : i32
    return %arg0, %arg1, %c0_i32 : i32, i32, i32
  }
}

module attributes {stable_mosaic.version = 11 : i64} {
  func.func @_point_conv_kernel(%arg0: i32, %arg1: i32, %arg2: memref<1x16x128xf32, #tpu.memory_space<vmem>>, %arg3: memref<128x256xf32, #tpu.memory_space<vmem>>, %arg4: memref<128x256xf32, #tpu.memory_space<vmem>>, %arg5: memref<1x16x256xf32, #tpu.memory_space<vmem>>, %arg6: memref<1x16x256xf32, #tpu.memory_space<vmem>>) attributes {dimension_semantics = [#tpu.dimension_semantics<parallel>, #tpu.dimension_semantics<parallel>], iteration_bounds = array<i64: 2, 1>, scalar_prefetch = 0 : i64, scratch_operands = 0 : i64, tpu.core_type = #tpu.core_type<tc>, window_params = [{transform_indices = @transform_0, window_bounds = array<i64: 1, 16, 128>}, {pipeline_mode = #tpu.pipeline_mode<synchronous>, transform_indices = @transform_1, window_bounds = array<i64: 128, 256>}, {pipeline_mode = #tpu.pipeline_mode<synchronous>, transform_indices = @transform_2, window_bounds = array<i64: 128, 256>}, {transform_indices = @transform_3, window_bounds = array<i64: 1, 16, 256>}, {transform_indices = @transform_4, window_bounds = array<i64: 1, 16, 256>}]} {
    %c0 = arith.constant 0 : index
    %c0_0 = arith.constant 0 : index
    %c0_1 = arith.constant 0 : index
    %0 = vector.load %arg2[%c0, %c0_0, %c0_1] : memref<1x16x128xf32, #tpu.memory_space<vmem>>, vector<1x16x128xf32>
    %1 = vector.shape_cast %0 : vector<1x16x128xf32> to vector<16x128xf32>
    %c0_2 = arith.constant 0 : index
    %c0_3 = arith.constant 0 : index
    %2 = vector.load %arg3[%c0_2, %c0_3] : memref<128x256xf32, #tpu.memory_space<vmem>>, vector<128x256xf32>
    %cst = arith.constant dense<0.000000e+00> : vector<16x256xf32>
    %3 = tpu.matmul %1, %2, %cst {dimension_numbers = #tpu.dot_dimension_numbers<[1], [0], [0], [1], [0, 0, 1, 1], [], []>} : vector<16x128xf32>, vector<128x256xf32>, vector<16x256xf32> -> vector<16x256xf32>
    %c0_4 = arith.constant 0 : index
    %c0_5 = arith.constant 0 : index
    %c0_6 = arith.constant 0 : index
    %4 = vector.load %arg5[%c0_4, %c0_5, %c0_6] : memref<1x16x256xf32, #tpu.memory_space<vmem>>, vector<1x16x256xf32>
    %5 = vector.shape_cast %4 : vector<1x16x256xf32> to vector<16x256xf32>
    %6 = vector.shape_cast %3 : vector<16x256xf32> to vector<1x16x256xf32>
    tpu.vector_store %arg5[%c0_4, %c0_5, %c0_6], %6 {strides = array<i32>} : memref<1x16x256xf32, #tpu.memory_space<vmem>>, vector<1x16x256xf32>,
    %c0_7 = arith.constant 0 : index
    %c0_8 = arith.constant 0 : index
    %7 = vector.load %arg4[%c0_7, %c0_8] : memref<128x256xf32, #tpu.memory_space<vmem>>, vector<128x256xf32>
    %cst_9 = arith.constant dense<0.000000e+00> : vector<16x256xf32>
    %8 = tpu.matmul %1, %7, %cst_9 {dimension_numbers = #tpu.dot_dimension_numbers<[1], [0], [0], [1], [0, 0, 1, 1], [], []>} : vector<16x128xf32>, vector<128x256xf32>, vector<16x256xf32> -> vector<16x256xf32>
    %c0_10 = arith.constant 0 : index
    %c0_11 = arith.constant 0 : index
    %c0_12 = arith.constant 0 : index
    %9 = vector.load %arg6[%c0_10, %c0_11, %c0_12] : memref<1x16x256xf32, #tpu.memory_space<vmem>>, vector<1x16x256xf32>
    %10 = vector.shape_cast %9 : vector<1x16x256xf32> to vector<16x256xf32>
    %11 = vector.shape_cast %8 : vector<16x256xf32> to vector<1x16x256xf32>
    tpu.vector_store %arg6[%c0_10, %c0_11, %c0_12], %11 {strides = array<i32>} : memref<1x16x256xf32, #tpu.memory_space<vmem>>, vector<1x16x256xf32>,
    return
  }
  func.func @transform_0(%arg0: i32, %arg1: i32) -> (i32, i32, i32) {
    %c0_i32 = arith.constant 0 : i32
    %c0_i32_0 = arith.constant 0 : i32
    return %arg0, %arg1, %c0_i32 : i32, i32, i32
  }
  func.func @transform_1(%arg0: i32, %arg1: i32) -> (i32, i32) {
    %c0_i32 = arith.constant 0 : i32
    %c0_i32_0 = arith.constant 0 : i32
    %c0_i32_1 = arith.constant 0 : i32
    return %c0_i32, %c0_i32_0 : i32, i32
  }
  func.func @transform_2(%arg0: i32, %arg1: i32) -> (i32, i32) {
    %c0_i32 = arith.constant 0 : i32
    %c0_i32_0 = arith.constant 0 : i32
    %c0_i32_1 = arith.constant 0 : i32
    return %c0_i32, %c0_i32_0 : i32, i32
  }
  func.func @transform_3(%arg0: i32, %arg1: i32) -> (i32, i32, i32) {
    %c0_i32 = arith.constant 0 : i32
    %c0_i32_0 = arith.constant 0 : i32
    return %arg0, %arg1, %c0_i32 : i32, i32, i32
  }
  func.func @transform_4(%arg0: i32, %arg1: i32) -> (i32, i32, i32) {
    %c0_i32 = arith.constant 0 : i32
    %c0_i32_0 = arith.constant 0 : i32
    return %arg0, %arg1, %c0_i32 : i32, i32, i32
  }
}

module attributes {stable_mosaic.version = 11 : i64} {
  func.func @_edge_reduce_kernel(%arg0: i32, %arg1: i32, %arg2: memref<1x4x16x256xf32, #tpu.memory_space<vmem>>, %arg3: memref<1x16x256xf32, #tpu.memory_space<vmem>>, %arg4: memref<1x256xf32, #tpu.memory_space<vmem>>, %arg5: memref<1x16x256xf32, #tpu.memory_space<vmem>>) attributes {dimension_semantics = [#tpu.dimension_semantics<parallel>, #tpu.dimension_semantics<parallel>], iteration_bounds = array<i64: 2, 1>, scalar_prefetch = 0 : i64, scratch_operands = 0 : i64, tpu.core_type = #tpu.core_type<tc>, window_params = [{transform_indices = @transform_0, window_bounds = array<i64: 1, 4, 16, 256>}, {transform_indices = @transform_1, window_bounds = array<i64: 1, 16, 256>}, {pipeline_mode = #tpu.pipeline_mode<synchronous>, transform_indices = @transform_2, window_bounds = array<i64: 1, 256>}, {transform_indices = @transform_3, window_bounds = array<i64: 1, 16, 256>}]} {
    %c0 = arith.constant 0 : index
    %c0_0 = arith.constant 0 : index
    %c0_1 = arith.constant 0 : index
    %c0_2 = arith.constant 0 : index
    %0 = vector.load %arg2[%c0, %c0_0, %c0_1, %c0_2] : memref<1x4x16x256xf32, #tpu.memory_space<vmem>>, vector<1x1x16x256xf32>
    %1 = vector.shape_cast %0 : vector<1x1x16x256xf32> to vector<16x256xf32>
    %c0_3 = arith.constant 0 : index
    %c1 = arith.constant 1 : index
    %c0_4 = arith.constant 0 : index
    %c0_5 = arith.constant 0 : index
    %2 = vector.load %arg2[%c0_3, %c1, %c0_4, %c0_5] : memref<1x4x16x256xf32, #tpu.memory_space<vmem>>, vector<1x1x16x256xf32>
    %3 = vector.shape_cast %2 : vector<1x1x16x256xf32> to vector<16x256xf32>
    %4 = arith.maximumf %1, %3 : vector<16x256xf32>
    %c0_6 = arith.constant 0 : index
    %c2 = arith.constant 2 : index
    %c0_7 = arith.constant 0 : index
    %c0_8 = arith.constant 0 : index
    %5 = vector.load %arg2[%c0_6, %c2, %c0_7, %c0_8] : memref<1x4x16x256xf32, #tpu.memory_space<vmem>>, vector<1x1x16x256xf32>
    %6 = vector.shape_cast %5 : vector<1x1x16x256xf32> to vector<16x256xf32>
    %7 = arith.maximumf %4, %6 : vector<16x256xf32>
    %c0_9 = arith.constant 0 : index
    %c3 = arith.constant 3 : index
    %c0_10 = arith.constant 0 : index
    %c0_11 = arith.constant 0 : index
    %8 = vector.load %arg2[%c0_9, %c3, %c0_10, %c0_11] : memref<1x4x16x256xf32, #tpu.memory_space<vmem>>, vector<1x1x16x256xf32>
    %9 = vector.shape_cast %8 : vector<1x1x16x256xf32> to vector<16x256xf32>
    %10 = arith.maximumf %7, %9 : vector<16x256xf32>
    %c0_12 = arith.constant 0 : index
    %c0_13 = arith.constant 0 : index
    %c0_14 = arith.constant 0 : index
    %11 = vector.load %arg3[%c0_12, %c0_13, %c0_14] : memref<1x16x256xf32, #tpu.memory_space<vmem>>, vector<1x16x256xf32>
    %12 = vector.shape_cast %11 : vector<1x16x256xf32> to vector<16x256xf32>
    %13 = arith.addf %10, %12 : vector<16x256xf32>
    %c0_15 = arith.constant 0 : index
    %c0_16 = arith.constant 0 : index
    %14 = vector.load %arg4[%c0_15, %c0_16] : memref<1x256xf32, #tpu.memory_space<vmem>>, vector<1x256xf32>
    %15 = vector.broadcast %14 : vector<1x256xf32> to vector<16x256xf32>
    %16 = arith.addf %13, %15 : vector<16x256xf32>
    %cst = arith.constant 0.000000e+00 : f32
    %17 = vector.broadcast %cst : f32 to vector<16x256xf32>
    %18 = arith.cmpf ogt, %16, %17 : vector<16x256xf32>
    %cst_17 = arith.constant 2.000000e-01 : f32
    %19 = vector.broadcast %cst_17 : f32 to vector<16x256xf32>
    %20 = arith.mulf %19, %16 : vector<16x256xf32>
    %21 = arith.select %18, %16, %20 : vector<16x256xi1>, vector<16x256xf32>
    %c0_18 = arith.constant 0 : index
    %c0_19 = arith.constant 0 : index
    %c0_20 = arith.constant 0 : index
    %22 = vector.load %arg5[%c0_18, %c0_19, %c0_20] : memref<1x16x256xf32, #tpu.memory_space<vmem>>, vector<1x16x256xf32>
    %23 = vector.shape_cast %22 : vector<1x16x256xf32> to vector<16x256xf32>
    %24 = vector.shape_cast %21 : vector<16x256xf32> to vector<1x16x256xf32>
    tpu.vector_store %arg5[%c0_18, %c0_19, %c0_20], %24 {strides = array<i32>} : memref<1x16x256xf32, #tpu.memory_space<vmem>>, vector<1x16x256xf32>,
    return
  }
  func.func @transform_0(%arg0: i32, %arg1: i32) -> (i32, i32, i32, i32) {
    %c0_i32 = arith.constant 0 : i32
    %c0_i32_0 = arith.constant 0 : i32
    %c0_i32_1 = arith.constant 0 : i32
    return %arg0, %c0_i32, %arg1, %c0_i32_0 : i32, i32, i32, i32
  }
  func.func @transform_1(%arg0: i32, %arg1: i32) -> (i32, i32, i32) {
    %c0_i32 = arith.constant 0 : i32
    %c0_i32_0 = arith.constant 0 : i32
    return %arg0, %arg1, %c0_i32 : i32, i32, i32
  }
  func.func @transform_2(%arg0: i32, %arg1: i32) -> (i32, i32) {
    %c0_i32 = arith.constant 0 : i32
    %c0_i32_0 = arith.constant 0 : i32
    %c0_i32_1 = arith.constant 0 : i32
    return %c0_i32, %c0_i32_0 : i32, i32
  }
  func.func @transform_3(%arg0: i32, %arg1: i32) -> (i32, i32, i32) {
    %c0_i32 = arith.constant 0 : i32
    %c0_i32_0 = arith.constant 0 : i32
    return %arg0, %arg1, %c0_i32 : i32, i32, i32
  }
}

module attributes {stable_mosaic.version = 11 : i64} {
  func.func @_head_kernel(%arg0: i32, %arg1: i32, %arg2: memref<1x16x64xf32, #tpu.memory_space<vmem>>, %arg3: memref<1x16x64xf32, #tpu.memory_space<vmem>>, %arg4: memref<1x16x128xf32, #tpu.memory_space<vmem>>, %arg5: memref<1x16x256xf32, #tpu.memory_space<vmem>>, %arg6: memref<64x64xf32, #tpu.memory_space<vmem>>, %arg7: memref<64x64xf32, #tpu.memory_space<vmem>>, %arg8: memref<128x64xf32, #tpu.memory_space<vmem>>, %arg9: memref<256x64xf32, #tpu.memory_space<vmem>>, %arg10: memref<1x64xf32, #tpu.memory_space<vmem>>, %arg11: memref<1x16x64xf32, #tpu.memory_space<vmem>>, %arg12: memref<1x1x64xi32, #tpu.memory_space<vmem>>, %arg13: memref<1x1x64xf32, #tpu.memory_space<vmem>>, %arg14: memref<1x64xf32, #tpu.memory_space<vmem>>, %arg15: memref<1x64xi32, #tpu.memory_space<vmem>>) attributes {dimension_semantics = [#tpu.dimension_semantics<parallel>, #tpu.dimension_semantics<arbitrary>], iteration_bounds = array<i64: 2, 1>, scalar_prefetch = 0 : i64, scratch_operands = 2 : i64, tpu.core_type = #tpu.core_type<tc>, window_params = [{transform_indices = @transform_0, window_bounds = array<i64: 1, 16, 64>}, {transform_indices = @transform_1, window_bounds = array<i64: 1, 16, 64>}, {transform_indices = @transform_2, window_bounds = array<i64: 1, 16, 128>}, {transform_indices = @transform_3, window_bounds = array<i64: 1, 16, 256>}, {pipeline_mode = #tpu.pipeline_mode<synchronous>, transform_indices = @transform_4, window_bounds = array<i64: 64, 64>}, {pipeline_mode = #tpu.pipeline_mode<synchronous>, transform_indices = @transform_5, window_bounds = array<i64: 64, 64>}, {pipeline_mode = #tpu.pipeline_mode<synchronous>, transform_indices = @transform_6, window_bounds = array<i64: 128, 64>}, {pipeline_mode = #tpu.pipeline_mode<synchronous>, transform_indices = @transform_7, window_bounds = array<i64: 256, 64>}, {pipeline_mode = #tpu.pipeline_mode<synchronous>, transform_indices = @transform_8, window_bounds = array<i64: 1, 64>}, {transform_indices = @transform_9, window_bounds = array<i64: 1, 16, 64>}, {transform_indices = @transform_10, window_bounds = array<i64: 1, 1, 64>}, {transform_indices = @transform_11, window_bounds = array<i64: 1, 1, 64>}]} {
    %c0_i32 = arith.constant 0 : i32
    %0 = arith.cmpi eq, %arg1, %c0_i32 : i32
    %1 = arith.extui %0 : i1 to i32
    %c0_i32_0 = arith.constant 0 : i32
    %2 = arith.cmpi ne, %1, %c0_i32_0 : i32
    scf.if %2 {
      %cst_44 = arith.constant 0xFF800000 : f32
      %56 = vector.broadcast %cst_44 : f32 to vector<1x64xf32>
      %c0_45 = arith.constant 0 : index
      %c0_46 = arith.constant 0 : index
      %57 = vector.load %arg14[%c0_45, %c0_46] : memref<1x64xf32, #tpu.memory_space<vmem>>, vector<1x64xf32>
      tpu.vector_store %arg14[%c0_45, %c0_46], %56 {strides = array<i32>} : memref<1x64xf32, #tpu.memory_space<vmem>>, vector<1x64xf32>,
      %c0_i32_47 = arith.constant 0 : i32
      %58 = vector.broadcast %c0_i32_47 : i32 to vector<1x64xi32>
      %c0_48 = arith.constant 0 : index
      %c0_49 = arith.constant 0 : index
      %59 = vector.load %arg15[%c0_48, %c0_49] : memref<1x64xi32, #tpu.memory_space<vmem>>, vector<1x64xi32>
      tpu.vector_store %arg15[%c0_48, %c0_49], %58 {strides = array<i32>} : memref<1x64xi32, #tpu.memory_space<vmem>>, vector<1x64xi32>,
    } else {
    }
    %c0 = arith.constant 0 : index
    %c0_1 = arith.constant 0 : index
    %c0_2 = arith.constant 0 : index
    %3 = vector.load %arg2[%c0, %c0_1, %c0_2] : memref<1x16x64xf32, #tpu.memory_space<vmem>>, vector<1x16x64xf32>
    %4 = vector.shape_cast %3 : vector<1x16x64xf32> to vector<16x64xf32>
    %c0_3 = arith.constant 0 : index
    %c0_4 = arith.constant 0 : index
    %5 = vector.load %arg6[%c0_3, %c0_4] : memref<64x64xf32, #tpu.memory_space<vmem>>, vector<64x64xf32>
    %cst = arith.constant dense<0.000000e+00> : vector<16x64xf32>
    %6 = tpu.matmul %4, %5, %cst {dimension_numbers = #tpu.dot_dimension_numbers<[1], [0], [0], [1], [0, 0, 1, 1], [], []>} : vector<16x64xf32>, vector<64x64xf32>, vector<16x64xf32> -> vector<16x64xf32>
    %c0_5 = arith.constant 0 : index
    %c0_6 = arith.constant 0 : index
    %c0_7 = arith.constant 0 : index
    %7 = vector.load %arg3[%c0_5, %c0_6, %c0_7] : memref<1x16x64xf32, #tpu.memory_space<vmem>>, vector<1x16x64xf32>
    %8 = vector.shape_cast %7 : vector<1x16x64xf32> to vector<16x64xf32>
    %c0_8 = arith.constant 0 : index
    %c0_9 = arith.constant 0 : index
    %9 = vector.load %arg7[%c0_8, %c0_9] : memref<64x64xf32, #tpu.memory_space<vmem>>, vector<64x64xf32>
    %cst_10 = arith.constant dense<0.000000e+00> : vector<16x64xf32>
    %10 = tpu.matmul %8, %9, %cst_10 {dimension_numbers = #tpu.dot_dimension_numbers<[1], [0], [0], [1], [0, 0, 1, 1], [], []>} : vector<16x64xf32>, vector<64x64xf32>, vector<16x64xf32> -> vector<16x64xf32>
    %11 = arith.addf %6, %10 : vector<16x64xf32>
    %c0_11 = arith.constant 0 : index
    %c0_12 = arith.constant 0 : index
    %c0_13 = arith.constant 0 : index
    %12 = vector.load %arg4[%c0_11, %c0_12, %c0_13] : memref<1x16x128xf32, #tpu.memory_space<vmem>>, vector<1x16x128xf32>
    %13 = vector.shape_cast %12 : vector<1x16x128xf32> to vector<16x128xf32>
    %c0_14 = arith.constant 0 : index
    %c0_15 = arith.constant 0 : index
    %14 = vector.load %arg8[%c0_14, %c0_15] : memref<128x64xf32, #tpu.memory_space<vmem>>, vector<128x64xf32>
    %cst_16 = arith.constant dense<0.000000e+00> : vector<16x64xf32>
    %15 = tpu.matmul %13, %14, %cst_16 {dimension_numbers = #tpu.dot_dimension_numbers<[1], [0], [0], [1], [0, 0, 1, 1], [], []>} : vector<16x128xf32>, vector<128x64xf32>, vector<16x64xf32> -> vector<16x64xf32>
    %16 = arith.addf %11, %15 : vector<16x64xf32>
    %c0_17 = arith.constant 0 : index
    %c0_18 = arith.constant 0 : index
    %c0_19 = arith.constant 0 : index
    %17 = vector.load %arg5[%c0_17, %c0_18, %c0_19] : memref<1x16x256xf32, #tpu.memory_space<vmem>>, vector<1x16x256xf32>
    %18 = vector.shape_cast %17 : vector<1x16x256xf32> to vector<16x256xf32>
    %c0_20 = arith.constant 0 : index
    %c0_21 = arith.constant 0 : index
    %19 = vector.load %arg9[%c0_20, %c0_21] : memref<256x64xf32, #tpu.memory_space<vmem>>, vector<256x64xf32>
    %cst_22 = arith.constant dense<0.000000e+00> : vector<16x64xf32>
    %20 = tpu.matmul %18, %19, %cst_22 {dimension_numbers = #tpu.dot_dimension_numbers<[1], [0], [0], [1], [0, 0, 1, 1], [], []>} : vector<16x256xf32>, vector<256x64xf32>, vector<16x64xf32> -> vector<16x64xf32>
    %21 = arith.addf %16, %20 : vector<16x64xf32>
    %c0_23 = arith.constant 0 : index
    %c0_24 = arith.constant 0 : index
    %22 = vector.load %arg10[%c0_23, %c0_24] : memref<1x64xf32, #tpu.memory_space<vmem>>, vector<1x64xf32>
    %23 = vector.broadcast %22 : vector<1x64xf32> to vector<16x64xf32>
    %24 = arith.addf %21, %23 : vector<16x64xf32>
    %cst_25 = arith.constant 0.000000e+00 : f32
    %25 = vector.broadcast %cst_25 : f32 to vector<16x64xf32>
    %26 = arith.cmpf ogt, %24, %25 : vector<16x64xf32>
    %cst_26 = arith.constant 2.000000e-01 : f32
    %27 = vector.broadcast %cst_26 : f32 to vector<16x64xf32>
    %28 = arith.mulf %27, %24 : vector<16x64xf32>
    %29 = arith.select %26, %24, %28 : vector<16x64xi1>, vector<16x64xf32>
    %c0_27 = arith.constant 0 : index
    %c0_28 = arith.constant 0 : index
    %c0_29 = arith.constant 0 : index
    %30 = vector.load %arg11[%c0_27, %c0_28, %c0_29] : memref<1x16x64xf32, #tpu.memory_space<vmem>>, vector<1x16x64xf32>
    %31 = vector.shape_cast %30 : vector<1x16x64xf32> to vector<16x64xf32>
    %32 = vector.shape_cast %29 : vector<16x64xf32> to vector<1x16x64xf32>
    tpu.vector_store %arg11[%c0_27, %c0_28, %c0_29], %32 {strides = array<i32>} : memref<1x16x64xf32, #tpu.memory_space<vmem>>, vector<1x16x64xf32>,
    %cst_30 = arith.constant dense<0xFF800000> : vector<64xf32>
    %33 = vector.multi_reduction <maximumf>, %29, %cst_30 [0] : vector<16x64xf32> to vector<64xf32>
    %34 = vector.shape_cast %33 : vector<64xf32> to vector<1x64xf32>
    %35 = tpu.iota {dimensions = array<i32: 0>} : vector<16x64xi32>
    %c16_i32 = arith.constant 16 : i32
    %36 = arith.muli %arg1, %c16_i32 : i32
    %37 = vector.broadcast %36 : i32 to vector<16x64xi32>
    %38 = arith.addi %35, %37 : vector<16x64xi32>
    %39 = vector.broadcast %34 : vector<1x64xf32> to vector<16x64xf32>
    %40 = arith.cmpf oeq, %29, %39 : vector<16x64xf32>
    %c1073741824_i32 = arith.constant 1073741824 : i32
    %41 = vector.broadcast %c1073741824_i32 : i32 to vector<16x64xi32>
    %42 = arith.select %40, %38, %41 : vector<16x64xi1>, vector<16x64xi32>
    %cst_31 = arith.constant dense<2147483647> : vector<64xi32>
    %43 = vector.multi_reduction <minsi>, %42, %cst_31 [0] : vector<16x64xi32> to vector<64xi32>
    %44 = vector.shape_cast %43 : vector<64xi32> to vector<1x64xi32>
    %c0_32 = arith.constant 0 : index
    %c0_33 = arith.constant 0 : index
    %45 = vector.load %arg14[%c0_32, %c0_33] : memref<1x64xf32, #tpu.memory_space<vmem>>, vector<1x64xf32>
    %46 = arith.cmpf ogt, %34, %45 : vector<1x64xf32>
    %c0_34 = arith.constant 0 : index
    %c0_35 = arith.constant 0 : index
    %47 = vector.load %arg15[%c0_34, %c0_35] : memref<1x64xi32, #tpu.memory_space<vmem>>, vector<1x64xi32>
    %48 = arith.select %46, %44, %47 : vector<1x64xi1>, vector<1x64xi32>
    %c0_36 = arith.constant 0 : index
    %c0_37 = arith.constant 0 : index
    %49 = vector.load %arg15[%c0_36, %c0_37] : memref<1x64xi32, #tpu.memory_space<vmem>>, vector<1x64xi32>
    tpu.vector_store %arg15[%c0_36, %c0_37], %48 {strides = array<i32>} : memref<1x64xi32, #tpu.memory_space<vmem>>, vector<1x64xi32>,
    %c0_38 = arith.constant 0 : index
    %c0_39 = arith.constant 0 : index
    %50 = vector.load %arg14[%c0_38, %c0_39] : memref<1x64xf32, #tpu.memory_space<vmem>>, vector<1x64xf32>
    %51 = arith.maximumf %50, %34 : vector<1x64xf32>
    %c0_40 = arith.constant 0 : index
    %c0_41 = arith.constant 0 : index
    %52 = vector.load %arg14[%c0_40, %c0_41] : memref<1x64xf32, #tpu.memory_space<vmem>>, vector<1x64xf32>
    tpu.vector_store %arg14[%c0_40, %c0_41], %51 {strides = array<i32>} : memref<1x64xf32, #tpu.memory_space<vmem>>, vector<1x64xf32>,
    %c0_i32_42 = arith.constant 0 : i32
    %53 = arith.cmpi eq, %arg1, %c0_i32_42 : i32
    %54 = arith.extui %53 : i1 to i32
    %c0_i32_43 = arith.constant 0 : i32
    %55 = arith.cmpi ne, %54, %c0_i32_43 : i32
    scf.if %55 {
      %c0_44 = arith.constant 0 : index
      %c0_45 = arith.constant 0 : index
      %56 = vector.load %arg14[%c0_44, %c0_45] : memref<1x64xf32, #tpu.memory_space<vmem>>, vector<1x64xf32>
      %c0_46 = arith.constant 0 : index
      %c0_47 = arith.constant 0 : index
      %c0_48 = arith.constant 0 : index
      %57 = vector.load %arg13[%c0_46, %c0_47, %c0_48] : memref<1x1x64xf32, #tpu.memory_space<vmem>>, vector<1x1x64xf32>
      %58 = vector.shape_cast %57 : vector<1x1x64xf32> to vector<1x64xf32>
      %59 = vector.shape_cast %56 : vector<1x64xf32> to vector<1x1x64xf32>
      tpu.vector_store %arg13[%c0_46, %c0_47, %c0_48], %59 {strides = array<i32>} : memref<1x1x64xf32, #tpu.memory_space<vmem>>, vector<1x1x64xf32>,
      %c0_49 = arith.constant 0 : index
      %c0_50 = arith.constant 0 : index
      %60 = vector.load %arg15[%c0_49, %c0_50] : memref<1x64xi32, #tpu.memory_space<vmem>>, vector<1x64xi32>
      %c0_51 = arith.constant 0 : index
      %c0_52 = arith.constant 0 : index
      %c0_53 = arith.constant 0 : index
      %61 = vector.load %arg12[%c0_51, %c0_52, %c0_53] : memref<1x1x64xi32, #tpu.memory_space<vmem>>, vector<1x1x64xi32>
      %62 = vector.shape_cast %61 : vector<1x1x64xi32> to vector<1x64xi32>
      %63 = vector.shape_cast %60 : vector<1x64xi32> to vector<1x1x64xi32>
      tpu.vector_store %arg12[%c0_51, %c0_52, %c0_53], %63 {strides = array<i32>} : memref<1x1x64xi32, #tpu.memory_space<vmem>>, vector<1x1x64xi32>,
    } else {
    }
    return
  }
  func.func @transform_0(%arg0: i32, %arg1: i32) -> (i32, i32, i32) {
    %c0_i32 = arith.constant 0 : i32
    %c0_i32_0 = arith.constant 0 : i32
    return %arg0, %arg1, %c0_i32 : i32, i32, i32
  }
  func.func @transform_1(%arg0: i32, %arg1: i32) -> (i32, i32, i32) {
    %c0_i32 = arith.constant 0 : i32
    %c0_i32_0 = arith.constant 0 : i32
    return %arg0, %arg1, %c0_i32 : i32, i32, i32
  }
  func.func @transform_2(%arg0: i32, %arg1: i32) -> (i32, i32, i32) {
    %c0_i32 = arith.constant 0 : i32
    %c0_i32_0 = arith.constant 0 : i32
    return %arg0, %arg1, %c0_i32 : i32, i32, i32
  }
  func.func @transform_3(%arg0: i32, %arg1: i32) -> (i32, i32, i32) {
    %c0_i32 = arith.constant 0 : i32
    %c0_i32_0 = arith.constant 0 : i32
    return %arg0, %arg1, %c0_i32 : i32, i32, i32
  }
  func.func @transform_4(%arg0: i32, %arg1: i32) -> (i32, i32) {
    %c0_i32 = arith.constant 0 : i32
    %c0_i32_0 = arith.constant 0 : i32
    %c0_i32_1 = arith.constant 0 : i32
    return %c0_i32, %c0_i32_0 : i32, i32
  }
  func.func @transform_5(%arg0: i32, %arg1: i32) -> (i32, i32) {
    %c0_i32 = arith.constant 0 : i32
    %c0_i32_0 = arith.constant 0 : i32
    %c0_i32_1 = arith.constant 0 : i32
    return %c0_i32, %c0_i32_0 : i32, i32
  }
  func.func @transform_6(%arg0: i32, %arg1: i32) -> (i32, i32) {
    %c0_i32 = arith.constant 0 : i32
    %c0_i32_0 = arith.constant 0 : i32
    %c0_i32_1 = arith.constant 0 : i32
    return %c0_i32, %c0_i32_0 : i32, i32
  }
  func.func @transform_7(%arg0: i32, %arg1: i32) -> (i32, i32) {
    %c0_i32 = arith.constant 0 : i32
    %c0_i32_0 = arith.constant 0 : i32
    %c0_i32_1 = arith.constant 0 : i32
    return %c0_i32, %c0_i32_0 : i32, i32
  }
  func.func @transform_8(%arg0: i32, %arg1: i32) -> (i32, i32) {
    %c0_i32 = arith.constant 0 : i32
    %c0_i32_0 = arith.constant 0 : i32
    %c0_i32_1 = arith.constant 0 : i32
    return %c0_i32, %c0_i32_0 : i32, i32
  }
  func.func @transform_9(%arg0: i32, %arg1: i32) -> (i32, i32, i32) {
    %c0_i32 = arith.constant 0 : i32
    %c0_i32_0 = arith.constant 0 : i32
    return %arg0, %arg1, %c0_i32 : i32, i32, i32
  }
  func.func @transform_10(%arg0: i32, %arg1: i32) -> (i32, i32, i32) {
    %c0_i32 = arith.constant 0 : i32
    %c0_i32_0 = arith.constant 0 : i32
    %c0_i32_1 = arith.constant 0 : i32
    return %arg0, %c0_i32, %c0_i32_0 : i32, i32, i32
  }
  func.func @transform_11(%arg0: i32, %arg1: i32) -> (i32, i32, i32) {
    %c0_i32 = arith.constant 0 : i32
    %c0_i32_0 = arith.constant 0 : i32
    %c0_i32_1 = arith.constant 0 : i32
    return %arg0, %c0_i32, %c0_i32_0 : i32, i32, i32
  }
}

</mosaic_0001>

<bundles_post_ra>
// kernel: neg.17
= control target key start
LH: loop header
LB: loop body
LE: loop exit
PB: predicated region body
PF: predicated region fallthrough
CT: control target
= control target key end

     0   :  { %s24_s0 = inlined_call_operand.vmem [shape: f32[2,16], index: 0, kind: input, shape index: {}]   ;;  %s25_s1 = inlined_call_operand.vmem [shape: f32[2,16], index: 1, kind: output, shape index: {}]  }
   0x1   :  { %v2_v0 = vld [vmem:[%s24_s0] sm:$0x3] }
   0x2   :  { %v5_v1 = vxor.u32 2147483648, %v2_v0 }
   0x4   :  { %7 = vst [vmem:[%s25_s1] sm:$0x3] %v5_v1 }

// kernel: dgcnn_critical_forward.10
= control target key start
LH: loop header
LB: loop body
LE: loop exit
PB: predicated region body
PF: predicated region fallthrough
CT: control target
= control target key end

     0   :  { %s481_s12 = smov 0   ;;  %s483_s13 = smov 0   ;;  %s520_s0 = inlined_call_operand.vmem [shape: f32[2,4,16,64], index: 0, kind: input, shape index: {}]   ;;  %s521_s1 = inlined_call_operand.vmem [shape: f32[2,16,64], index: 1, kind: input, shape index: {}]   ;;  %s522_s2 = inlined_call_operand.vmem [shape: f32[1,64], index: 2, kind: input, shape index: {}]   ;;  %s523_s3 = inlined_call_operand.vmem [shape: f32[2,16,64], index: 3, kind: output, shape index: {}]  }
   0x1   :  { %s485_s14 = smov 0  }
   0x2 LB: > { %s25_s15 = sadd.s32 1, %s455_s13  ;;  %p394_p0 = scmp.ge.s32.totalorder %s459_s14, 1  ;;  %s459_s14 = sphi %s485_s14, %s13_s14   ;;  %s455_s13 = sphi %s483_s13, %s525_s13   ;;  %s451_s12 = sphi %s481_s12, %s524_s12  }
   0x3   : > { %p27_p1 = scmp.ge.s32.totalorder %s25_s15, 2  ;;  %p175_p2 = scmp.lt.s32.totalorder %s459_s14, 3 }
   0x5   : > { %s527_s15 = smov (%p27_p1, %s25_s15), 0  ;;  %p176_p3 = pnand %p394_p0, %p175_p2 }
   0x6   : > { %p217_p4 = scmp.lt.s32.totalorder (!%p176_p3), %s451_s12, 1  ;;  %v407_v16 = vld [vmem:[%s522_s2] ss:$0 sm:$0xff] (!%p176_p3)  ;;  %vm282_vm1 = vcmask (!%p176_p3), 523264  }
   0x7   : > { %179 = sbr.rel (%p176_p3) target bundleno = 33 (0x21), region = 32 }
   0xe   : > { %s529_s12 = smov (!%p217_p4, %s451_s12), 1 }
   0xf   : > { %s410_s16 = sshll.u32 %s529_s12, 6  ;;  %s411_s17 = sshll.u32 %s529_s12, 4 }
  0x10   : > { %s224_s20 = scalar_lea.vmem %s520_s0, %s410_s16  ;;  %s234_s23 = scalar_lea.vmem %s521_s1, %s411_s17 }
  0x11   : > { %v246_v0 = vld [vmem:[%s224_s20] sm:$0xff]  ;;  %v247_v1 = vld [vmem:[%s224_s20 + $0x8] sm:$0xff]  ;;  %v401_v2 = vld [vmem:[%s224_s20 + $0x10] sm:$0xff]  ;;  %s244_s28 = scalar_lea.vmem %s523_s3, %s411_s17 }
  0x12   : > { %v402_v3 = vld [vmem:[%s224_s20 + $0x18] sm:$0xff]  ;;  %v251_v4 = vmax.f32 %v246_v0, %v401_v2  ;;  %v403_v5 = vld [vmem:[%s224_s20 + $0x20] sm:$0xff]  ;;  %v404_v6 = vld [vmem:[%s224_s20 + $0x28] sm:$0xff] }
  0x13   : > { %v252_v7 = vmax.f32 %v247_v1, %v402_v3  ;;  %v405_v8 = vld [vmem:[%s224_s20 + $0x30] sm:$0xff]  ;;  %v406_v10 = vld [vmem:[%s224_s20 + $0x38] sm:$0xff]  ;;  %v263_v12 = vld [vmem:[%s234_s23] sm:$0xff] }
  0x14   : > { %v256_v9 = vmax.f32 %v251_v4, %v403_v5  ;;  %v264_v14 = vld [vmem:[%s234_s23 + $0x8] sm:$0xff] }
  0x15   : > { %v257_v11 = vmax.f32 %v252_v7, %v404_v6 }
  0x16   : > { %v261_v13 = vmax.f32 %v256_v9, %v405_v8 }
  0x17   : > { %v262_v15 = vmax.f32 %v257_v11, %v406_v10 }
  0x18   : > { %v265_v17 = vadd.f32 %v263_v12, %v261_v13 }
  0x19   : > { %v266_v18 = vadd.f32 %v264_v14, %v262_v15 }
  0x1a   : > { %v274_v19 = vadd.f32 %v407_v16, %v265_v17 }
  0x1b   : > { %v275_v20 = vadd.f32 %v407_v16, %v266_v18 }
  0x1c   : > { %vm276_vm0 = vcmp.gt.f32.partialorder %v274_v19, 0.0  ;;  %v278_v21 = vmul.f32 0.2, %v274_v19 }
  0x1d   : > { %vm277_vm2 = vcmp.gt.f32.partialorder %v275_v20, 0.0  ;;  %v279_v22 = vmul.f32 0.2, %v275_v20 }
  0x1e   : > { %v280_v23 = vsel %vm276_vm0, %v274_v19, %v278_v21 }
  0x1f   : > { %283 = vst.msk [vmem:[%s244_s28] sm:$0xff] %vm282_vm1, %v280_v23  ;;  %v281_v24 = vsel %vm277_vm2, %v275_v20, %v279_v22 }
  0x20   : > { %284 = vst.msk [vmem:[%s244_s28 + $0x8] sm:$0xff] %vm282_vm1, %v281_v24 }
  0x21 PF: > { %s13_s14 = sadd.s32 1, %s459_s14   ;;  %s524_s12 = smov %s455_s13 }
  0x22   : > { %p10_p5 = scmp.ge.s32.totalorder %s13_s14, 4   ;;  %s525_s13 = smov %s527_s15 }
  0x24   :  { %12 = sbr.rel (!%p10_p5) target bundleno = 2 (0x2), region = 68 }

// kernel: dgcnn_critical_forward.9
= control target key start
LH: loop header
LB: loop body
LE: loop exit
PB: predicated region body
PF: predicated region fallthrough
CT: control target
= control target key end

     0   :  { %s682_s15 = smov 0   ;;  %s684_s16 = smov 0   ;;  %s724_s0 = inlined_call_operand.vmem [shape: f32[2,16,3], index: 0, kind: input, shape index: {}]   ;;  %s725_s1 = inlined_call_operand.vmem [shape: f32[3,64], index: 1, kind: input, shape index: {}]   ;;  %s726_s2 = inlined_call_operand.vmem [shape: f32[3,64], index: 2, kind: input, shape index: {}]   ;;  %s727_s3 = inlined_call_operand.vmem [shape: f32[2,16,64], index: 3, kind: output, shape index: {0}]   ;;  %s728_s4 = inlined_call_operand.vmem [shape: f32[2,16,64], index: 4, kind: output, shape index: {1}]  }
   0x1   :  { %s686_s17 = smov 0  }
   0x2 LB: > { %s27_s18 = sadd.s32 1, %s651_s16  ;;  %p575_p0 = scmp.ge.s32.totalorder %s655_s17, 1  ;;  %s655_s17 = sphi %s686_s17, %s15_s17   ;;  %s651_s16 = sphi %s684_s16, %s730_s16   ;;  %s647_s15 = sphi %s682_s15, %s729_s15  }
   0x3   : > { %p29_p1 = scmp.ge.s32.totalorder %s27_s18, 2  ;;  %p188_p2 = scmp.lt.s32.totalorder %s655_s17, 3 }
   0x5   : > { %s732_s18 = smov (%p29_p1, %s27_s18), 0  ;;  %p189_p3 = pnand %p575_p0, %p188_p2 }
   0x6   : > { %v263_v0 = vld [vmem:[%s725_s1] sm:$0x7] (!%p189_p3)  ;;  %vm271_vm0 = vcmask (!%p189_p3), 1042432   ;;  %p232_p4 = scmp.lt.s32.totalorder (!%p189_p3), %s647_s15, 1  ;;  %vm264_vm1 = vcmask (!%p189_p3), 23552   ;;  %vm350_vm2 = vcmask (!%p189_p3), 523264  }
   0x7   : > { %192 = sbr.rel (%p189_p3) target bundleno = 233 (0xe9), region = 32  ;;  %v353_v1 = vld [vmem:[%s726_s2] sm:$0x7] (!%p189_p3)  ;;  %599 = vmatprep.subr.msk.mxu0 (!%p189_p3), %vm271_vm0, %v263_v0 }
   0x8   : > { %604 = vmatprep.subr.msk.mxu1 (!%p189_p3), %vm271_vm0, %v353_v1  ;;  %600 = vmatpush3.msk.msra.mxu0 (!%p189_p3), %vm271_vm0, %v263_v0 }
   0x9   : > { %605 = vmatpush3.msk.msra.mxu1 (!%p189_p3), %vm271_vm0, %v353_v1 }
   0xe   : > { %s734_s15 = smov (!%p232_p4, %s647_s15), 1 }
   0xf   : > { %s590_s23 = sshll.u32 %s734_s15, 4 }
  0x10   : > { %s239_s26 = scalar_lea.vmem %s724_s0, %s590_s23  ;;  %s249_s29 = scalar_lea.vmem %s727_s3, %s590_s23 }
  0x11   : > { %v261_v2 = vld [vmem:[%s239_s26] sm:$0xff]  ;;  %v262_v3 = vld [vmem:[%s239_s26 + $0x8] sm:$0xff]  ;;  %s259_s6 = scalar_lea.vmem %s728_s4, %s590_s23 }
  0x12   : > { %601 = vmatprep.mubr.msk.f32.mxu0 %vm264_vm1, %v261_v2  ;;  %606 = vmatprep.mubr.msk.f32.mxu1 %vm264_vm1, %v261_v2 }
  0x13   : > { %602 = vmatmul.mubr.msk.f32.vlgmr.msra.gmra.mrb[0].mxu0 %vm264_vm1, %v262_v3  ;;  %607 = vmatmul.mubr.msk.f32.vlgmr.msra.gmra.mrb[0].mxu1 %vm264_vm1, %v262_v3 }
  0xe6   : > { %v603_v4 = vpop.f32.mrb[0].mxu0  ;;  %v608_v5 = vpop.f32.mrb[0].mxu1 }
  0xe7   : > { %352 = vst.msk [vmem:[%s249_s29 + $0x8] sm:$0xff] %vm350_vm2, %v603_v4  ;;  %433 = vst.msk [vmem:[%s259_s6 + $0x8] sm:$0xff] %vm350_vm2, %v608_v5  ;;  %v341_v6 = vpop.f32.mrb[1].mxu0  ;;  %v423_v7 = vpop.f32.mrb[1].mxu1 }
  0xe8   : > { %351 = vst.msk [vmem:[%s249_s29] sm:$0xff] %vm350_vm2, %v341_v6  ;;  %432 = vst.msk [vmem:[%s259_s6] sm:$0xff] %vm350_vm2, %v423_v7 }
  0xe9 PF: > { %s15_s17 = sadd.s32 1, %s655_s17   ;;  %s729_s15 = smov %s651_s16 }
  0xea   : > { %p12_p5 = scmp.ge.s32.totalorder %s15_s17, 4   ;;  %s730_s16 = smov %s732_s18 }
  0xec   :  { %14 = sbr.rel (!%p12_p5) target bundleno = 2 (0x2), region = 74 }

// kernel: dgcnn_critical_forward.11
= control target key start
LH: loop header
LB: loop body
LE: loop exit
PB: predicated region body
PF: predicated region fallthrough
CT: control target
= control target key end

     0   :  { %s760_s15 = smov 0   ;;  %s762_s16 = smov 0   ;;  %s857_s0 = inlined_call_operand.vmem [shape: f32[2,16,64], index: 0, kind: input, shape index: {}]   ;;  %s858_s1 = inlined_call_operand.vmem [shape: f32[64,64], index: 1, kind: input, shape index: {}]   ;;  %s859_s2 = inlined_call_operand.vmem [shape: f32[64,64], index: 2, kind: input, shape index: {}]   ;;  %s860_s3 = inlined_call_operand.vmem [shape: f32[2,16,64], index: 3, kind: output, shape index: {0}]   ;;  %s861_s4 = inlined_call_operand.vmem [shape: f32[2,16,64], index: 4, kind: output, shape index: {1}]  }
   0x1   :  { %s764_s17 = smov 0  }
   0x2 LB: > { %s27_s18 = sadd.s32 1, %s729_s16  ;;  %p581_p0 = scmp.ge.s32.totalorder %s733_s17, 1  ;;  %s733_s17 = sphi %s764_s17, %s15_s17   ;;  %s729_s16 = sphi %s762_s16, %s863_s16   ;;  %s725_s15 = sphi %s760_s15, %s862_s15  }
   0x3   : > { %p29_p1 = scmp.ge.s32.totalorder %s27_s18, 2  ;;  %p188_p2 = scmp.lt.s32.totalorder %s733_s17, 3 }
   0x5   : > { %s865_s18 = smov (%p29_p1, %s27_s18), 0  ;;  %p189_p3 = pnand %p581_p0, %p188_p2 }
   0x6   : > { %v263_v0 = vld [vmem:[%s858_s1] sm:$0xff] (!%p189_p3)  ;;  %v264_v1 = vld [vmem:[%s858_s1 + $0x8] sm:$0xff] (!%p189_p3)  ;;  %p232_p4 = scmp.lt.s32.totalorder (!%p189_p3), %s725_s15, 1  ;;  %v265_v5 = vld [vmem:[%s858_s1 + $0x10] sm:$0xff] (!%p189_p3)  ;;  %vm271_vm0 = vcmask (!%p189_p3), 523264  }
   0x7   : > { %192 = sbr.rel (%p189_p3) target bundleno = 240 (0xf0), region = 32  ;;  %v355_v2 = vld [vmem:[%s859_s2] sm:$0xff] (!%p189_p3)  ;;  %v655_v3 = vpack.c.bf16 (!%p189_p3), %v264_v1, %v263_v0  ;;  %v356_v4 = vld [vmem:[%s859_s2 + $0x8] sm:$0xff] (!%p189_p3)  ;;  %v266_v6 = vld [vmem:[%s858_s1 + $0x18] sm:$0xff] (!%p189_p3) }
   0x8   : > { %v671_v7 = vpack.c.bf16 (!%p189_p3), %v356_v4, %v355_v2  ;;  %v659_v8 = vpack.c.bf16 (!%p189_p3), %v266_v6, %v265_v5  ;;  %v357_v9 = vld [vmem:[%s859_s2 + $0x10] sm:$0xff] (!%p189_p3)  ;;  %v358_v10 = vld [vmem:[%s859_s2 + $0x18] sm:$0xff] (!%p189_p3)  ;;  %v267_v11 = vld [vmem:[%s858_s1 + $0x20] sm:$0xff] (!%p189_p3) }
   0x9   : > { %656 = vmatprep.subr.bf16.mxu0 (!%p189_p3), %v655_v3  ;;  %v675_v12 = vpack.c.bf16 (!%p189_p3), %v358_v10, %v357_v9  ;;  %v268_v13 = vld [vmem:[%s858_s1 + $0x28] sm:$0xff] (!%p189_p3)  ;;  %v359_v14 = vld [vmem:[%s859_s2 + $0x20] sm:$0xff] (!%p189_p3)  ;;  %v269_v18 = vld [vmem:[%s858_s1 + $0x30] sm:$0xff] (!%p189_p3) }
   0xa   : > { %v360_v15 = vld [vmem:[%s859_s2 + $0x28] sm:$0xff] (!%p189_p3)  ;;  %672 = vmatprep.subr.bf16.mxu1 (!%p189_p3), %v671_v7  ;;  %658 = vmatpush3.bf16.msra.mxu0 (!%p189_p3), %v655_v3  ;;  %v663_v16 = vpack.c.bf16 (!%p189_p3), %v268_v13, %v267_v11  ;;  %v270_v19 = vld [vmem:[%s858_s1 + $0x38] sm:$0xff] (!%p189_p3)  ;;  %v361_v21 = vld [vmem:[%s859_s2 + $0x30] sm:$0xff] (!%p189_p3) }
   0xb   : > { %674 = vmatpush3.bf16.msra.mxu1 (!%p189_p3), %v671_v7  ;;  %660 = vmatprep.subr.bf16.mxu0 (!%p189_p3), %v659_v8  ;;  %v679_v17 = vpack.c.bf16 (!%p189_p3), %v360_v15, %v359_v14  ;;  %v362_v22 = vld [vmem:[%s859_s2 + $0x38] sm:$0xff] (!%p189_p3)  ;;  %v667_v23 = vpack.c.bf16 (!%p189_p3), %v270_v19, %v269_v18 }
   0xc   : > { %676 = vmatprep.subr.bf16.mxu1 (!%p189_p3), %v675_v12  ;;  %v683_v24 = vpack.c.bf16 (!%p189_p3), %v362_v22, %v361_v21 }
   0xe   : > { %s867_s15 = smov (!%p232_p4, %s725_s15), 1  ;;  %662 = vmatpush3.bf16.msra.mxu0 %v659_v8 }
   0xf   : > { %s814_s21 = sshll.u32 %s867_s15, 4  ;;  %678 = vmatpush3.bf16.msra.mxu1 %v675_v12  ;;  %664 = vmatprep.subr.bf16.mxu0 %v663_v16 }
  0x10   : > { %s239_s24 = scalar_lea.vmem %s857_s0, %s814_s21  ;;  %680 = vmatprep.subr.bf16.mxu1 %v679_v17  ;;  %s249_s8 = scalar_lea.vmem %s860_s3, %s814_s21 }
  0x11   : > { %v261_v20 = vld [vmem:[%s239_s24] sm:$0xff]  ;;  %v262_v25 = vld [vmem:[%s239_s24 + $0x8] sm:$0xff]  ;;  %s259_s11 = scalar_lea.vmem %s861_s4, %s814_s21 }
  0x12   : > { %633 = vmatprep.mubr.msk.f32.mxu0 %vm271_vm0, %v261_v20  ;;  %652 = vmatprep.mubr.msk.f32.mxu1 %vm271_vm0, %v261_v20 }
  0x13   : > { %666 = vmatpush3.bf16.msra.mxu0 %v663_v16  ;;  %682 = vmatpush3.bf16.msra.mxu1 %v679_v17 }
  0x14   : > { %668 = vmatprep.subr.bf16.mxu0 %v667_v23  ;;  %684 = vmatprep.subr.bf16.mxu1 %v683_v24 }
  0x17   : > { %670 = vmatpush3.bf16.msra.mxu0 %v667_v23  ;;  %686 = vmatpush3.bf16.msra.mxu1 %v683_v24 }
  0x1a   : > { %634 = vmatmul.mubr.msk.f32.vlgmr.msra.gmra.mrb[0].mxu0 %vm271_vm0, %v262_v25  ;;  %653 = vmatmul.mubr.msk.f32.vlgmr.msra.gmra.mrb[0].mxu1 %vm271_vm0, %v262_v25 }
  0xed   : > { %v635_v26 = vpop.f32.mrb[0].mxu0  ;;  %v654_v27 = vpop.f32.mrb[0].mxu1 }
  0xee   : > { %354 = vst.msk [vmem:[%s249_s8 + $0x8] sm:$0xff] %vm271_vm0, %v635_v26  ;;  %v344_v28 = vpop.f32.mrb[1].mxu0  ;;  %439 = vst.msk [vmem:[%s259_s11 + $0x8] sm:$0xff] %vm271_vm0, %v654_v27  ;;  %v429_v29 = vpop.f32.mrb[1].mxu1 }
  0xef   : > { %353 = vst.msk [vmem:[%s249_s8] sm:$0xff] %vm271_vm0, %v344_v28  ;;  %438 = vst.msk [vmem:[%s259_s11] sm:$0xff] %vm271_vm0, %v429_v29 }
  0xf0 PF: > { %s15_s17 = sadd.s32 1, %s733_s17   ;;  %s862_s15 = smov %s729_s16 }
  0xf1   : > { %p12_p5 = scmp.ge.s32.totalorder %s15_s17, 4   ;;  %s863_s16 = smov %s865_s18 }
  0xf3   :  { %14 = sbr.rel (!%p12_p5) target bundleno = 2 (0x2), region = 74 }

// kernel: dgcnn_critical_forward.14
= control target key start
LH: loop header
LB: loop body
LE: loop exit
PB: predicated region body
PF: predicated region fallthrough
CT: control target
= control target key end

     0   :  { %s480_s12 = smov 0   ;;  %s482_s13 = smov 0   ;;  %s519_s0 = inlined_call_operand.vmem [shape: f32[2,4,16,128], index: 0, kind: input, shape index: {}]   ;;  %s520_s1 = inlined_call_operand.vmem [shape: f32[2,16,128], index: 1, kind: input, shape index: {}]   ;;  %s521_s2 = inlined_call_operand.vmem [shape: f32[1,128], index: 2, kind: input, shape index: {}]   ;;  %s522_s3 = inlined_call_operand.vmem [shape: f32[2,16,128], index: 3, kind: output, shape index: {}]  }
   0x1   :  { %s484_s14 = smov 0  }
   0x2 LB: > { %s25_s15 = sadd.s32 1, %s454_s13  ;;  %p393_p0 = scmp.ge.s32.totalorder %s458_s14, 1  ;;  %s458_s14 = sphi %s484_s14, %s13_s14   ;;  %s454_s13 = sphi %s482_s13, %s524_s13   ;;  %s450_s12 = sphi %s480_s12, %s523_s12  }
   0x3   : > { %p27_p1 = scmp.ge.s32.totalorder %s25_s15, 2  ;;  %p175_p2 = scmp.lt.s32.totalorder %s458_s14, 3 }
   0x5   : > { %s526_s15 = smov (%p27_p1, %s25_s15), 0  ;;  %p176_p3 = pnand %p393_p0, %p175_p2 }
   0x6   : > { %p217_p4 = scmp.lt.s32.totalorder (!%p176_p3), %s450_s12, 1  ;;  %v406_v16 = vld [vmem:[%s521_s2] ss:$0 sm:$0xff] (!%p176_p3) }
   0x7   : > { %179 = sbr.rel (%p176_p3) target bundleno = 33 (0x21), region = 32 }
   0xe   : > { %s528_s12 = smov (!%p217_p4, %s450_s12), 1 }
   0xf   : > { %s409_s16 = sshll.u32 %s528_s12, 6  ;;  %s410_s17 = sshll.u32 %s528_s12, 4 }
  0x10   : > { %s224_s20 = scalar_lea.vmem %s519_s0, %s409_s16  ;;  %s234_s23 = scalar_lea.vmem %s520_s1, %s410_s17 }
  0x11   : > { %v246_v0 = vld [vmem:[%s224_s20] sm:$0xff]  ;;  %v247_v1 = vld [vmem:[%s224_s20 + $0x8] sm:$0xff]  ;;  %v400_v2 = vld [vmem:[%s224_s20 + $0x10] sm:$0xff]  ;;  %s244_s28 = scalar_lea.vmem %s522_s3, %s410_s17 }
  0x12   : > { %v401_v3 = vld [vmem:[%s224_s20 + $0x18] sm:$0xff]  ;;  %v251_v4 = vmax.f32 %v246_v0, %v400_v2  ;;  %v402_v5 = vld [vmem:[%s224_s20 + $0x20] sm:$0xff]  ;;  %v403_v6 = vld [vmem:[%s224_s20 + $0x28] sm:$0xff] }
  0x13   : > { %v252_v7 = vmax.f32 %v247_v1, %v401_v3  ;;  %v404_v8 = vld [vmem:[%s224_s20 + $0x30] sm:$0xff]  ;;  %v405_v10 = vld [vmem:[%s224_s20 + $0x38] sm:$0xff]  ;;  %v263_v12 = vld [vmem:[%s234_s23] sm:$0xff] }
  0x14   : > { %v256_v9 = vmax.f32 %v251_v4, %v402_v5  ;;  %v264_v14 = vld [vmem:[%s234_s23 + $0x8] sm:$0xff] }
  0x15   : > { %v257_v11 = vmax.f32 %v252_v7, %v403_v6 }
  0x16   : > { %v261_v13 = vmax.f32 %v256_v9, %v404_v8 }
  0x17   : > { %v262_v15 = vmax.f32 %v257_v11, %v405_v10 }
  0x18   : > { %v265_v17 = vadd.f32 %v263_v12, %v261_v13 }
  0x19   : > { %v266_v18 = vadd.f32 %v264_v14, %v262_v15 }
  0x1a   : > { %v274_v19 = vadd.f32 %v406_v16, %v265_v17 }
  0x1b   : > { %v275_v20 = vadd.f32 %v406_v16, %v266_v18 }
  0x1c   : > { %vm276_vm0 = vcmp.gt.f32.partialorder %v274_v19, 0.0  ;;  %v278_v21 = vmul.f32 0.2, %v274_v19 }
  0x1d   : > { %vm277_vm1 = vcmp.gt.f32.partialorder %v275_v20, 0.0  ;;  %v279_v22 = vmul.f32 0.2, %v275_v20 }
  0x1e   : > { %v280_v23 = vsel %vm276_vm0, %v274_v19, %v278_v21 }
  0x1f   : > { %282 = vst [vmem:[%s244_s28] sm:$0xff] %v280_v23  ;;  %v281_v24 = vsel %vm277_vm1, %v275_v20, %v279_v22 }
  0x20   : > { %283 = vst [vmem:[%s244_s28 + $0x8] sm:$0xff] %v281_v24 }
  0x21 PF: > { %s13_s14 = sadd.s32 1, %s458_s14   ;;  %s523_s12 = smov %s454_s13 }
  0x22   : > { %p10_p5 = scmp.ge.s32.totalorder %s13_s14, 4   ;;  %s524_s13 = smov %s526_s15 }
  0x24   :  { %12 = sbr.rel (!%p10_p5) target bundleno = 2 (0x2), region = 68 }

// kernel: dgcnn_critical_forward.13
= control target key start
LH: loop header
LB: loop body
LE: loop exit
PB: predicated region body
PF: predicated region fallthrough
CT: control target
= control target key end

     0   :  { %s760_s15 = smov 0   ;;  %s762_s16 = smov 0   ;;  %s853_s0 = inlined_call_operand.vmem [shape: f32[2,16,64], index: 0, kind: input, shape index: {}]   ;;  %s854_s1 = inlined_call_operand.vmem [shape: f32[64,128], index: 1, kind: input, shape index: {}]   ;;  %s855_s2 = inlined_call_operand.vmem [shape: f32[64,128], index: 2, kind: input, shape index: {}]   ;;  %s856_s3 = inlined_call_operand.vmem [shape: f32[2,16,128], index: 3, kind: output, shape index: {0}]   ;;  %s857_s4 = inlined_call_operand.vmem [shape: f32[2,16,128], index: 4, kind: output, shape index: {1}]  }
   0x1   :  { %s764_s17 = smov 0  }
   0x2 LB: > { %s27_s18 = sadd.s32 1, %s729_s16  ;;  %p581_p0 = scmp.ge.s32.totalorder %s733_s17, 1  ;;  %s733_s17 = sphi %s764_s17, %s15_s17   ;;  %s729_s16 = sphi %s762_s16, %s859_s16   ;;  %s725_s15 = sphi %s760_s15, %s858_s15  }
   0x3   : > { %p29_p1 = scmp.ge.s32.totalorder %s27_s18, 2  ;;  %p188_p2 = scmp.lt.s32.totalorder %s733_s17, 3 }
   0x5   : > { %s861_s18 = smov (%p29_p1, %s27_s18), 0  ;;  %p189_p3 = pnand %p581_p0, %p188_p2 }
   0x6   : > { %v263_v0 = vld [vmem:[%s854_s1] sm:$0xff] (!%p189_p3)  ;;  %v264_v1 = vld [vmem:[%s854_s1 + $0x8] sm:$0xff] (!%p189_p3)  ;;  %p232_p4 = scmp.lt.s32.totalorder (!%p189_p3), %s725_s15, 1  ;;  %v265_v5 = vld [vmem:[%s854_s1 + $0x10] sm:$0xff] (!%p189_p3)  ;;  %vm271_vm0 = vcmask (!%p189_p3), 523264  }
   0x7   : > { %192 = sbr.rel (%p189_p3) target bundleno = 240 (0xf0), region = 32  ;;  %v355_v2 = vld [vmem:[%s855_s2] sm:$0xff] (!%p189_p3)  ;;  %v655_v3 = vpack.c.bf16 (!%p189_p3), %v264_v1, %v263_v0  ;;  %v356_v4 = vld [vmem:[%s855_s2 + $0x8] sm:$0xff] (!%p189_p3)  ;;  %v266_v6 = vld [vmem:[%s854_s1 + $0x18] sm:$0xff] (!%p189_p3) }
   0x8   : > { %v671_v7 = vpack.c.bf16 (!%p189_p3), %v356_v4, %v355_v2  ;;  %v659_v8 = vpack.c.bf16 (!%p189_p3), %v266_v6, %v265_v5  ;;  %v357_v9 = vld [vmem:[%s855_s2 + $0x10] sm:$0xff] (!%p189_p3)  ;;  %v358_v10 = vld [vmem:[%s855_s2 + $0x18] sm:$0xff] (!%p189_p3)  ;;  %v267_v11 = vld [vmem:[%s854_s1 + $0x20] sm:$0xff] (!%p189_p3) }
   0x9   : > { %656 = vmatprep.subr.bf16.mxu0 (!%p189_p3), %v655_v3  ;;  %v675_v12 = vpack.c.bf16 (!%p189_p3), %v358_v10, %v357_v9  ;;  %v268_v13 = vld [vmem:[%s854_s1 + $0x28] sm:$0xff] (!%p189_p3)  ;;  %v359_v14 = vld [vmem:[%s855_s2 + $0x20] sm:$0xff] (!%p189_p3)  ;;  %v269_v18 = vld [vmem:[%s854_s1 + $0x30] sm:$0xff] (!%p189_p3) }
   0xa   : > { %v360_v15 = vld [vmem:[%s855_s2 + $0x28] sm:$0xff] (!%p189_p3)  ;;  %672 = vmatprep.subr.bf16.mxu1 (!%p189_p3), %v671_v7  ;;  %658 = vmatpush3.bf16.msra.mxu0 (!%p189_p3), %v655_v3  ;;  %v663_v16 = vpack.c.bf16 (!%p189_p3), %v268_v13, %v267_v11  ;;  %v270_v19 = vld [vmem:[%s854_s1 + $0x38] sm:$0xff] (!%p189_p3)  ;;  %v361_v21 = vld [vmem:[%s855_s2 + $0x30] sm:$0xff] (!%p189_p3) }
   0xb   : > { %674 = vmatpush3.bf16.msra.mxu1 (!%p189_p3), %v671_v7  ;;  %660 = vmatprep.subr.bf16.mxu0 (!%p189_p3), %v659_v8  ;;  %v679_v17 = vpack.c.bf16 (!%p189_p3), %v360_v15, %v359_v14  ;;  %v362_v22 = vld [vmem:[%s855_s2 + $0x38] sm:$0xff] (!%p189_p3)  ;;  %v667_v23 = vpack.c.bf16 (!%p189_p3), %v270_v19, %v269_v18 }
   0xc   : > { %676 = vmatprep.subr.bf16.mxu1 (!%p189_p3), %v675_v12  ;;  %v683_v24 = vpack.c.bf16 (!%p189_p3), %v362_v22, %v361_v21 }
   0xe   : > { %s863_s15 = smov (!%p232_p4, %s725_s15), 1  ;;  %662 = vmatpush3.bf16.msra.mxu0 %v659_v8 }
   0xf   : > { %s814_s21 = sshll.u32 %s863_s15, 4  ;;  %678 = vmatpush3.bf16.msra.mxu1 %v675_v12  ;;  %664 = vmatprep.subr.bf16.mxu0 %v663_v16 }
  0x10   : > { %s239_s24 = scalar_lea.vmem %s853_s0, %s814_s21  ;;  %680 = vmatprep.subr.bf16.mxu1 %v679_v17  ;;  %s249_s8 = scalar_lea.vmem %s856_s3, %s814_s21 }
  0x11   : > { %v261_v20 = vld [vmem:[%s239_s24] sm:$0xff]  ;;  %v262_v25 = vld [vmem:[%s239_s24 + $0x8] sm:$0xff]  ;;  %s259_s11 = scalar_lea.vmem %s857_s4, %s814_s21 }
  0x12   : > { %633 = vmatprep.mubr.msk.f32.mxu0 %vm271_vm0, %v261_v20  ;;  %652 = vmatprep.mubr.msk.f32.mxu1 %vm271_vm0, %v261_v20 }
  0x13   : > { %666 = vmatpush3.bf16.msra.mxu0 %v663_v16  ;;  %682 = vmatpush3.bf16.msra.mxu1 %v679_v17 }
  0x14   : > { %668 = vmatprep.subr.bf16.mxu0 %v667_v23  ;;  %684 = vmatprep.subr.bf16.mxu1 %v683_v24 }
  0x17   : > { %670 = vmatpush3.bf16.msra.mxu0 %v667_v23  ;;  %686 = vmatpush3.bf16.msra.mxu1 %v683_v24 }
  0x1a   : > { %634 = vmatmul.mubr.msk.f32.vlgmr.msra.gmra.mrb[0].mxu0 %vm271_vm0, %v262_v25  ;;  %653 = vmatmul.mubr.msk.f32.vlgmr.msra.gmra.mrb[0].mxu1 %vm271_vm0, %v262_v25 }
  0xed   : > { %v635_v26 = vpop.f32.mrb[0].mxu0  ;;  %v654_v27 = vpop.f32.mrb[0].mxu1 }
  0xee   : > { %354 = vst [vmem:[%s249_s8 + $0x8] sm:$0xff] %v635_v26  ;;  %v344_v28 = vpop.f32.mrb[1].mxu0  ;;  %439 = vst [vmem:[%s259_s11 + $0x8] sm:$0xff] %v654_v27  ;;  %v429_v29 = vpop.f32.mrb[1].mxu1 }
  0xef   : > { %353 = vst [vmem:[%s249_s8] sm:$0xff] %v344_v28  ;;  %438 = vst [vmem:[%s259_s11] sm:$0xff] %v429_v29 }
  0xf0 PF: > { %s15_s17 = sadd.s32 1, %s733_s17   ;;  %s858_s15 = smov %s729_s16 }
  0xf1   : > { %p12_p5 = scmp.ge.s32.totalorder %s15_s17, 4   ;;  %s859_s16 = smov %s861_s18 }
  0xf3   :  { %14 = sbr.rel (!%p12_p5) target bundleno = 2 (0x2), region = 74 }

// kernel: dgcnn_critical_forward.15
= control target key start
LH: loop header
LB: loop body
LE: loop exit
PB: predicated region body
PF: predicated region fallthrough
CT: control target
= control target key end

     0   :  { %s797_s15 = smov 0   ;;  %s799_s16 = smov 0   ;;  %s1039_s0 = inlined_call_operand.vmem [shape: f32[2,16,128], index: 0, kind: input, shape index: {}]   ;;  %s1040_s1 = inlined_call_operand.vmem [shape: f32[128,256], index: 1, kind: input, shape index: {}]   ;;  %s1041_s2 = inlined_call_operand.vmem [shape: f32[128,256], index: 2, kind: input, shape index: {}]   ;;  %s1042_s3 = inlined_call_operand.vmem [shape: f32[2,16,256], index: 3, kind: output, shape index: {0}]   ;;  %s1043_s4 = inlined_call_operand.vmem [shape: f32[2,16,256], index: 4, kind: output, shape index: {1}]  }
   0x1   :  { %s801_s17 = smov 0  }
   0x2 LB: > { %s27_s18 = sadd.s32 1, %s765_s16  ;;  %p646_p0 = scmp.ge.s32.totalorder %s769_s17, 1  ;;  %s769_s17 = sphi %s801_s17, %s15_s17   ;;  %s765_s16 = sphi %s799_s16, %s1045_s16   ;;  %s761_s15 = sphi %s797_s15, %s1044_s15  }
   0x3   : > { %p29_p1 = scmp.ge.s32.totalorder %s27_s18, 2  ;;  %p188_p2 = scmp.lt.s32.totalorder %s769_s17, 3 }
   0x5   : > { %s1047_s18 = smov (%p29_p1, %s27_s18), 0  ;;  %p189_p3 = pnand %p646_p0, %p188_p2 }
   0x6   : > { %v268_v0 = vld [vmem:[%s1040_s1 + $0x8] sm:$0xff] (!%p189_p3)  ;;  %v270_v1 = vld [vmem:[%s1040_s1 + $0x18] sm:$0xff] (!%p189_p3)  ;;  %v267_v5 = vld [vmem:[%s1040_s1] sm:$0xff] (!%p189_p3)  ;;  %v771_v7 = vmov (!%p189_p3), 0.0   ;;  %p234_p4 = scmp.lt.s32.totalorder (!%p189_p3), %s761_s15, 1 }
   0x7   : > { %192 = sbr.rel (%p189_p3) target bundleno = 260 (0x104), region = 32  ;;  %v381_v2 = vld [vmem:[%s1041_s2 + $0x8] sm:$0xff] (!%p189_p3)  ;;  %v658_v3 = vpack.c.bf16 (!%p189_p3), %v270_v1, %v268_v0  ;;  %v383_v4 = vld [vmem:[%s1041_s2 + $0x18] sm:$0xff] (!%p189_p3)  ;;  %v269_v6 = vld [vmem:[%s1040_s1 + $0x10] sm:$0xff] (!%p189_p3)  ;;  %363 = vmatprep.mubr.f32.mxu0 (!%p189_p3), %v771_v7  ;;  %476 = vmatprep.mubr.f32.mxu1 (!%p189_p3), %v771_v7 }
   0x8   : > { %v690_v8 = vpack.c.bf16 (!%p189_p3), %v383_v4, %v381_v2  ;;  %v660_v9 = vpack.c.bf16 (!%p189_p3), %v269_v6, %v267_v5  ;;  %v380_v10 = vld [vmem:[%s1041_s2] sm:$0xff] (!%p189_p3)  ;;  %v382_v11 = vld [vmem:[%s1041_s2 + $0x10] sm:$0xff] (!%p189_p3)  ;;  %v272_v12 = vld [vmem:[%s1040_s1 + $0x28] sm:$0xff] (!%p189_p3) }
   0x9   : > { %659 = vmatprep.subr.bf16.mxu0 (!%p189_p3), %v658_v3  ;;  %v692_v13 = vpack.c.bf16 (!%p189_p3), %v382_v11, %v380_v10  ;;  %v274_v14 = vld [vmem:[%s1040_s1 + $0x38] sm:$0xff] (!%p189_p3)  ;;  %v385_v15 = vld [vmem:[%s1041_s2 + $0x28] sm:$0xff] (!%p189_p3)  ;;  %v271_v19 = vld [vmem:[%s1040_s1 + $0x20] sm:$0xff] (!%p189_p3) }
   0xa   : > { %v387_v16 = vld [vmem:[%s1041_s2 + $0x38] sm:$0xff] (!%p189_p3)  ;;  %691 = vmatprep.subr.bf16.mxu1 (!%p189_p3), %v690_v8  ;;  %661 = vmatpush1.bf16.msra.mxu0 (!%p189_p3), %v660_v9  ;;  %v662_v17 = vpack.c.bf16 (!%p189_p3), %v274_v14, %v272_v12  ;;  %v273_v20 = vld [vmem:[%s1040_s1 + $0x30] sm:$0xff] (!%p189_p3)  ;;  %v384_v21 = vld [vmem:[%s1041_s2 + $0x20] sm:$0xff] (!%p189_p3) }
   0xb   : > { %v694_v18 = vpack.c.bf16 (!%p189_p3), %v387_v16, %v385_v15  ;;  %693 = vmatpush1.bf16.msra.mxu1 (!%p189_p3), %v692_v13  ;;  %v664_v22 = vpack.c.bf16 (!%p189_p3), %v273_v20, %v271_v19  ;;  %v386_v23 = vld [vmem:[%s1041_s2 + $0x30] sm:$0xff] (!%p189_p3)  ;;  %v276_v24 = vld [vmem:[%s1040_s1 + $0x48] sm:$0xff] (!%p189_p3)  ;;  %v278_v25 = vld [vmem:[%s1040_s1 + $0x58] sm:$0xff] (!%p189_p3) }
   0xc   : > { %663 = vmatprep.subr.bf16.mxu0 (!%p189_p3), %v662_v17  ;;  %v696_v26 = vpack.c.bf16 (!%p189_p3), %v386_v23, %v384_v21  ;;  %v666_v27 = vpack.c.bf16 (!%p189_p3), %v278_v25, %v276_v24  ;;  %v389_v28 = vld [vmem:[%s1041_s2 + $0x48] sm:$0xff] (!%p189_p3)  ;;  %v391_v29 = vld [vmem:[%s1041_s2 + $0x58] sm:$0xff] (!%p189_p3)  ;;  %v275_v30 = vld [vmem:[%s1040_s1 + $0x40] sm:$0xff] (!%p189_p3) }
   0xd   : > { %695 = vmatprep.subr.bf16.mxu1 (!%p189_p3), %v694_v18  ;;  %v698_v31 = vpack.c.bf16 (!%p189_p3), %v391_v29, %v389_v28  ;;  %v277_v32 = vld [vmem:[%s1040_s1 + $0x50] sm:$0xff] (!%p189_p3)  ;;  %v388_v33 = vld [vmem:[%s1041_s2 + $0x40] sm:$0xff] (!%p189_p3)  ;;  %v280_v36 = vld [vmem:[%s1040_s1 + $0x68] sm:$0xff] (!%p189_p3) }
   0xe   : > { %v390_v34 = vld [vmem:[%s1041_s2 + $0x50] sm:$0xff]  ;;  %665 = vmatpush1.bf16.msra.mxu0 %v664_v22  ;;  %v668_v35 = vpack.c.bf16 %v277_v32, %v275_v30  ;;  %v282_v37 = vld [vmem:[%s1040_s1 + $0x78] sm:$0xff]  ;;  %v393_v38 = vld [vmem:[%s1041_s2 + $0x68] sm:$0xff]  ;;  %s1049_s15 = smov (!%p234_p4, %s761_s15), 1 }
   0xf   : > { %697 = vmatpush1.bf16.msra.mxu1 %v696_v26  ;;  %667 = vmatprep.subr.bf16.mxu0 %v666_v27  ;;  %v700_v39 = vpack.c.bf16 %v390_v34, %v388_v33  ;;  %v670_v40 = vpack.c.bf16 %v282_v37, %v280_v36  ;;  %v395_v41 = vld [vmem:[%s1041_s2 + $0x78] sm:$0xff]  ;;  %v279_v42 = vld [vmem:[%s1040_s1 + $0x60] sm:$0xff]  ;;  %v281_v43 = vld [vmem:[%s1040_s1 + $0x70] sm:$0xff]  ;;  %s655_s11 = sshll.u32 %s1049_s15, 4  ;;  %s656_s19 = sshll.u32 %s1049_s15, 5 }
  0x10   : > { %699 = vmatprep.subr.bf16.mxu1 %v698_v31  ;;  %v702_v44 = vpack.c.bf16 %v395_v41, %v393_v38  ;;  %v392_v45 = vld [vmem:[%s1041_s2 + $0x60] sm:$0xff]  ;;  %v394_v46 = vld [vmem:[%s1041_s2 + $0x70] sm:$0xff]  ;;  %v284_v47 = vld [vmem:[%s1040_s1 + $0x88] sm:$0xff]  ;;  %v672_v51 = vpack.c.bf16 %v281_v43, %v279_v42  ;;  %s241_s14 = scalar_lea.vmem %s1039_s0, %s655_s11  ;;  %s252_s22 = scalar_lea.vmem %s1042_s3, %s656_s19 }
  0x11   : > { %v286_v48 = vld [vmem:[%s1040_s1 + $0x98] sm:$0xff]  ;;  %v397_v49 = vld [vmem:[%s1041_s2 + $0x88] sm:$0xff]  ;;  %v704_v52 = vpack.c.bf16 %v394_v46, %v392_v45  ;;  %v283_v54 = vld [vmem:[%s1040_s1 + $0x80] sm:$0xff]  ;;  %s263_s25 = scalar_lea.vmem %s1043_s4, %s656_s19 }
  0x12   : > { %v399_v50 = vld [vmem:[%s1041_s2 + $0x98] sm:$0xff]  ;;  %669 = vmatpush1.bf16.msra.mxu0 %v668_v35  ;;  %v674_v53 = vpack.c.bf16 %v286_v48, %v284_v47  ;;  %v285_v55 = vld [vmem:[%s1040_s1 + $0x90] sm:$0xff]  ;;  %v396_v56 = vld [vmem:[%s1041_s2 + $0x80] sm:$0xff] }
  0x13   : > { %701 = vmatpush1.bf16.msra.mxu1 %v700_v39  ;;  %671 = vmatprep.subr.bf16.mxu0 %v670_v40  ;;  %v706_v57 = vpack.c.bf16 %v399_v50, %v397_v49  ;;  %v398_v58 = vld [vmem:[%s1041_s2 + $0x90] sm:$0xff]  ;;  %v288_v59 = vld [vmem:[%s1040_s1 + $0xa8] sm:$0xff]  ;;  %v290_v60 = vld [vmem:[%s1040_s1 + $0xb8] sm:$0xff]  ;;  %v676_v63 = vpack.c.bf16 %v285_v55, %v283_v54 }
  0x14   : > { %703 = vmatprep.subr.bf16.mxu1 %v702_v44  ;;  %v401_v61 = vld [vmem:[%s1041_s2 + $0xa8] sm:$0xff]  ;;  %v403_v62 = vld [vmem:[%s1041_s2 + $0xb8] sm:$0xff]  ;;  %v708_v0 = vpack.c.bf16 %v398_v58, %v396_v56  ;;  %v678_v1 = vpack.c.bf16 %v290_v60, %v288_v59  ;;  %v287_v2 = vld [vmem:[%s1040_s1 + $0xa0] sm:$0xff] }
  0x15   : > { %v289_v3 = vld [vmem:[%s1040_s1 + $0xb0] sm:$0xff]  ;;  %v400_v4 = vld [vmem:[%s1041_s2 + $0xa0] sm:$0xff]  ;;  %v710_v5 = vpack.c.bf16 %v403_v62, %v401_v61  ;;  %v292_v8 = vld [vmem:[%s1040_s1 + $0xc8] sm:$0xff] }
  0x16   : > { %673 = vmatpush1.bf16.msra.mxu0 %v672_v51  ;;  %v402_v6 = vld [vmem:[%s1041_s2 + $0xb0] sm:$0xff]  ;;  %v294_v9 = vld [vmem:[%s1040_s1 + $0xd8] sm:$0xff]  ;;  %v405_v10 = vld [vmem:[%s1041_s2 + $0xc8] sm:$0xff]  ;;  %v680_v12 = vpack.c.bf16 %v289_v3, %v287_v2 }
  0x17   : > { %705 = vmatpush1.bf16.msra.mxu1 %v704_v52  ;;  %675 = vmatprep.subr.bf16.mxu0 %v674_v53  ;;  %v407_v11 = vld [vmem:[%s1041_s2 + $0xd8] sm:$0xff]  ;;  %v712_v13 = vpack.c.bf16 %v402_v6, %v400_v4  ;;  %v682_v14 = vpack.c.bf16 %v294_v9, %v292_v8  ;;  %v291_v15 = vld [vmem:[%s1040_s1 + $0xc0] sm:$0xff]  ;;  %v293_v16 = vld [vmem:[%s1040_s1 + $0xd0] sm:$0xff] }
  0x18   : > { %707 = vmatprep.subr.bf16.mxu1 %v706_v57  ;;  %v404_v17 = vld [vmem:[%s1041_s2 + $0xc0] sm:$0xff]  ;;  %v714_v18 = vpack.c.bf16 %v407_v11, %v405_v10  ;;  %v406_v19 = vld [vmem:[%s1041_s2 + $0xd0] sm:$0xff]  ;;  %v296_v20 = vld [vmem:[%s1040_s1 + $0xe8] sm:$0xff]  ;;  %v684_v24 = vpack.c.bf16 %v293_v16, %v291_v15 }
  0x19   : > { %v298_v21 = vld [vmem:[%s1040_s1 + $0xf8] sm:$0xff]  ;;  %v409_v22 = vld [vmem:[%s1041_s2 + $0xe8] sm:$0xff]  ;;  %v716_v25 = vpack.c.bf16 %v406_v19, %v404_v17  ;;  %v295_v27 = vld [vmem:[%s1040_s1 + $0xe0] sm:$0xff] }
  0x1a   : > { %677 = vmatpush1.bf16.msra.mxu0 %v676_v63  ;;  %v411_v23 = vld [vmem:[%s1041_s2 + $0xf8] sm:$0xff]  ;;  %v686_v26 = vpack.c.bf16 %v298_v21, %v296_v20  ;;  %v297_v28 = vld [vmem:[%s1040_s1 + $0xf0] sm:$0xff]  ;;  %v408_v30 = vld [vmem:[%s1041_s2 + $0xe0] sm:$0xff] }
  0x1b   : > { %709 = vmatpush1.bf16.msra.mxu1 %v708_v0  ;;  %679 = vmatprep.subr.bf16.mxu0 %v678_v1  ;;  %v718_v29 = vpack.c.bf16 %v411_v23, %v409_v22  ;;  %v410_v31 = vld [vmem:[%s1041_s2 + $0xf0] sm:$0xff]  ;;  %v688_v32 = vpack.c.bf16 %v297_v28, %v295_v27  ;;  %v265_v34 = vld [vmem:[%s241_s14] sm:$0xff]  ;;  %v266_v35 = vld [vmem:[%s241_s14 + $0x8] sm:$0xff] }
  0x1c   : > { %711 = vmatprep.subr.bf16.mxu1 %v710_v5  ;;  %v720_v33 = vpack.c.bf16 %v410_v31, %v408_v30 }
  0x1e   : > { %681 = vmatpush1.bf16.msra.mxu0 %v680_v12 }
  0x1f   : > { %713 = vmatpush1.bf16.msra.mxu1 %v712_v13  ;;  %683 = vmatprep.subr.bf16.mxu0 %v682_v14 }
  0x20   : > { %715 = vmatprep.subr.bf16.mxu1 %v714_v18 }
  0x22   : > { %685 = vmatpush1.bf16.msra.mxu0 %v684_v24 }
  0x23   : > { %717 = vmatpush1.bf16.msra.mxu1 %v716_v25  ;;  %687 = vmatprep.subr.bf16.mxu0 %v686_v26 }
  0x24   : > { %719 = vmatprep.subr.bf16.mxu1 %v718_v29 }
  0x26   : > { %689 = vmatpush1.bf16.msra.mxu0 %v688_v32 }
  0x27   : > { %721 = vmatpush1.bf16.msra.mxu1 %v720_v33 }
  0x29   : > { %364 = vmatmul.mubr.f32.vlgmr.msra.gmra.mrb[0].mxu0 %v265_v34 }
  0x2a   : > { %477 = vmatmul.mubr.f32.vlgmr.msra.gmra.mrb[0].mxu1 %v265_v34  ;;  %369 = vmatprep.mubr.f32.mxu0 %v771_v7 }
  0x2b   : > { %482 = vmatprep.mubr.f32.mxu1 %v771_v7 }
  0x2d   : > { %370 = vmatmul.mubr.f32.gmra.mrb[2].mxu0 %v266_v35 }
  0x2e   : > { %483 = vmatmul.mubr.f32.gmra.mrb[2].mxu1 %v266_v35 }
  0xfc   : > { %v365_v36 = vpop.f32.mrb[0].mxu0 }
  0xfd   : > { %376 = vst [vmem:[%s252_s22] sm:$0xff] %v365_v36  ;;  %v478_v37 = vpop.f32.mrb[0].mxu1  ;;  %v367_v38 = vpop.f32.mrb[1].mxu0 }
  0xfe   : > { %489 = vst [vmem:[%s263_s25] sm:$0xff] %v478_v37  ;;  %377 = vst [vmem:[%s252_s22 + $0x8] sm:$0xff] %v367_v38  ;;  %v480_v39 = vpop.f32.mrb[1].mxu1 }
  0xff   : > { %490 = vst [vmem:[%s263_s25 + $0x8] sm:$0xff] %v480_v39 }
 0x100   : > { %v371_v7 = vpop.f32.mrb[2].mxu0 }
 0x101   : > { %378 = vst [vmem:[%s252_s22 + $0x10] sm:$0xff] %v371_v7  ;;  %v484_v40 = vpop.f32.mrb[2].mxu1  ;;  %v373_v41 = vpop.f32.mrb[3].mxu0 }
 0x102   : > { %491 = vst [vmem:[%s263_s25 + $0x10] sm:$0xff] %v484_v40  ;;  %379 = vst [vmem:[%s252_s22 + $0x18] sm:$0xff] %v373_v41  ;;  %v486_v42 = vpop.f32.mrb[3].mxu1 }
 0x103   : > { %492 = vst [vmem:[%s263_s25 + $0x18] sm:$0xff] %v486_v42 }
 0x104 PF: > { %s15_s17 = sadd.s32 1, %s769_s17   ;;  %s1044_s15 = smov %s765_s16 }
 0x105   : > { %p12_p5 = scmp.ge.s32.totalorder %s15_s17, 4   ;;  %s1045_s16 = smov %s1047_s18 }
 0x107   :  { %14 = sbr.rel (!%p12_p5) target bundleno = 2 (0x2), region = 74 }

// kernel: dgcnn_critical_forward.16
= control target key start
LH: loop header
LB: loop body
LE: loop exit
PB: predicated region body
PF: predicated region fallthrough
CT: control target
= control target key end

     0   :  { %s538_s12 = smov 0   ;;  %s540_s13 = smov 0   ;;  %s609_s0 = inlined_call_operand.vmem [shape: f32[2,4,16,256], index: 0, kind: input, shape index: {}]   ;;  %s610_s1 = inlined_call_operand.vmem [shape: f32[2,16,256], index: 1, kind: input, shape index: {}]   ;;  %s611_s2 = inlined_call_operand.vmem [shape: f32[1,256], index: 2, kind: input, shape index: {}]   ;;  %s612_s3 = inlined_call_operand.vmem [shape: f32[2,16,256], index: 3, kind: output, shape index: {}]  }
   0x1   :  { %s542_s14 = smov 0  }
   0x2 LB: > { %s25_s15 = sadd.s32 1, %s512_s13  ;;  %p446_p0 = scmp.ge.s32.totalorder %s516_s14, 1  ;;  %s516_s14 = sphi %s542_s14, %s13_s14   ;;  %s512_s13 = sphi %s540_s13, %s614_s13   ;;  %s508_s12 = sphi %s538_s12, %s613_s12  }
   0x3   : > { %p27_p1 = scmp.ge.s32.totalorder %s25_s15, 2  ;;  %p177_p2 = scmp.lt.s32.totalorder %s516_s14, 3 }
   0x5   : > { %s616_s15 = smov (%p27_p1, %s25_s15), 0  ;;  %p178_p3 = pnand %p446_p0, %p177_p2 }
   0x6   : > { %p222_p4 = scmp.lt.s32.totalorder (!%p178_p3), %s508_s12, 1  ;;  %v295_v0 = vlaneseq (!%p178_p3)  ;;  %v293_v6 = vld [vmem:[%s611_s2] sm:$0x3] (!%p178_p3) }
   0x7   : > { %181 = sbr.rel (%p178_p3) target bundleno = 37 (0x25), region = 32 }
   0x8   : > { %v296_v1 = vshrl.u32 (!%p178_p3), %v295_v0, 7 }
   0xa   : > { %v297_v7 = vsub.s32 (!%p178_p3), 0, %v296_v1  ;;  %v301_v15 = vsub.s32 (!%p178_p3), 1, %v296_v1 }
   0xc   : > { %v298_v23 = vrot.slane (!%p178_p3), %v293_v6, %v297_v7  ;;  %v302_v33 = vrot.slane (!%p178_p3), %v293_v6, %v301_v15 }
   0xe   : > { %s618_s12 = smov (!%p222_p4, %s508_s12), 1 }
   0xf   : > { %s467_s16 = sshll.u32 %s618_s12, 7  ;;  %s468_s17 = sshll.u32 %s618_s12, 5 }
  0x10   : > { %s563_s20 = scalar_lea.vmem %s609_s0, %s467_s16  ;;  %s570_s23 = scalar_lea.vmem %s610_s1, %s468_s17 }
  0x11   : > { %v254_v2 = vld [vmem:[%s563_s20] sm:$0xff]  ;;  %v255_v8 = vld [vmem:[%s563_s20 + $0x8] sm:$0xff]  ;;  %v256_v16 = vld [vmem:[%s563_s20 + $0x10] sm:$0xff]  ;;  %s252_s28 = scalar_lea.vmem %s612_s3, %s468_s17 }
  0x12   : > { %v453_v3 = vld [vmem:[%s563_s20 + $0x20] sm:$0xff]  ;;  %v454_v10 = vld [vmem:[%s563_s20 + $0x28] sm:$0xff]  ;;  %v455_v17 = vld [vmem:[%s563_s20 + $0x30] sm:$0xff] }
  0x13   : > { %v457_v4 = vld [vmem:[%s563_s20 + $0x40] sm:$0xff]  ;;  %v263_v5 = vmax.f32 %v254_v2, %v453_v3  ;;  %v458_v11 = vld [vmem:[%s563_s20 + $0x48] sm:$0xff]  ;;  %v264_v14 = vmax.f32 %v255_v8, %v454_v10  ;;  %v265_v19 = vmax.f32 %v256_v16, %v455_v17  ;;  %v459_v20 = vld [vmem:[%s563_s20 + $0x50] sm:$0xff] }
  0x14   : > { %v461_v9 = vld [vmem:[%s563_s20 + $0x60] sm:$0xff]  ;;  %v462_v18 = vld [vmem:[%s563_s20 + $0x68] sm:$0xff]  ;;  %v463_v21 = vld [vmem:[%s563_s20 + $0x70] sm:$0xff] }
  0x15   : > { %v272_v12 = vmax.f32 %v263_v5, %v457_v4  ;;  %v285_v13 = vld [vmem:[%s570_s23] sm:$0xff]  ;;  %v273_v24 = vmax.f32 %v264_v14, %v458_v11  ;;  %v257_v25 = vld [vmem:[%s563_s20 + $0x18] sm:$0xff]  ;;  %v286_v28 = vld [vmem:[%s570_s23 + $0x8] sm:$0xff]  ;;  %v274_v29 = vmax.f32 %v265_v19, %v459_v20 }
  0x16   : > { %v456_v26 = vld [vmem:[%s563_s20 + $0x38] sm:$0xff]  ;;  %v287_v34 = vld [vmem:[%s570_s23 + $0x10] sm:$0xff] }
  0x17   : > { %v281_v22 = vmax.f32 %v272_v12, %v461_v9  ;;  %v460_v27 = vld [vmem:[%s563_s20 + $0x58] sm:$0xff]  ;;  %v266_v30 = vmax.f32 %v257_v25, %v456_v26  ;;  %v282_v32 = vmax.f32 %v273_v24, %v462_v18  ;;  %v283_v36 = vmax.f32 %v274_v29, %v463_v21 }
  0x18   : > { %v464_v35 = vld [vmem:[%s563_s20 + $0x78] sm:$0xff] }
  0x19   : > { %v289_v31 = vadd.f32 %v285_v13, %v281_v22  ;;  %v275_v37 = vmax.f32 %v266_v30, %v460_v27  ;;  %v290_v39 = vadd.f32 %v286_v28, %v282_v32  ;;  %v288_v40 = vld [vmem:[%s570_s23 + $0x18] sm:$0xff]  ;;  %v291_v41 = vadd.f32 %v287_v34, %v283_v36 }
  0x1b   : > { %v305_v38 = vadd.f32 %v298_v23, %v289_v31  ;;  %v284_v42 = vmax.f32 %v275_v37, %v464_v35  ;;  %v306_v44 = vadd.f32 %v302_v33, %v290_v39  ;;  %v307_v45 = vadd.f32 %v298_v23, %v291_v41 }
  0x1d   : > { %vm309_vm0 = vcmp.gt.f32.partialorder %v305_v38, 0.0  ;;  %v313_v43 = vmul.f32 0.2, %v305_v38  ;;  %v292_v46 = vadd.f32 %v288_v40, %v284_v42  ;;  %vm310_vm1 = vcmp.gt.f32.partialorder %v306_v44, 0.0 }
  0x1e   : > { %v314_v48 = vmul.f32 0.2, %v306_v44  ;;  %vm311_vm2 = vcmp.gt.f32.partialorder %v307_v45, 0.0  ;;  %v315_v49 = vmul.f32 0.2, %v307_v45 }
  0x1f   : > { %v317_v47 = vsel %vm309_vm0, %v305_v38, %v313_v43  ;;  %v308_v50 = vadd.f32 %v302_v33, %v292_v46 }
  0x20   : > { %321 = vst [vmem:[%s252_s28] sm:$0xff] %v317_v47  ;;  %v318_v51 = vsel %vm310_vm1, %v306_v44, %v314_v48  ;;  %v319_v52 = vsel %vm311_vm2, %v307_v45, %v315_v49 }
  0x21   : > { %322 = vst [vmem:[%s252_s28 + $0x8] sm:$0xff] %v318_v51  ;;  %vm312_vm3 = vcmp.gt.f32.partialorder %v308_v50, 0.0  ;;  %v316_v53 = vmul.f32 0.2, %v308_v50  ;;  %323 = vst [vmem:[%s252_s28 + $0x10] sm:$0xff] %v319_v52 }
  0x23   : > { %v320_v54 = vsel %vm312_vm3, %v308_v50, %v316_v53 }
  0x24   : > { %324 = vst [vmem:[%s252_s28 + $0x18] sm:$0xff] %v320_v54 }
  0x25 PF: > { %s13_s14 = sadd.s32 1, %s516_s14   ;;  %s613_s12 = smov %s512_s13 }
  0x26   : > { %p10_p5 = scmp.ge.s32.totalorder %s13_s14, 4   ;;  %s614_s13 = smov %s616_s15 }
  0x28   :  { %12 = sbr.rel (!%p10_p5) target bundleno = 2 (0x2), region = 68 }

// kernel: dgcnn_critical_forward.17
= control target key start
LH: loop header
LB: loop body
LE: loop exit
PB: predicated region body
PF: predicated region fallthrough
CT: control target
= control target key end

     0   :  { %s2241_s0 = inlined_call_operand.vmem [shape: f32[2,16,64], index: 0, kind: input, shape index: {}]   ;;  %s2242_s1 = inlined_call_operand.vmem [shape: f32[2,16,64], index: 1, kind: input, shape index: {}]   ;;  %s2243_s2 = inlined_call_operand.vmem [shape: f32[2,16,128], index: 2, kind: input, shape index: {}]   ;;  %s2244_s3 = inlined_call_operand.vmem [shape: f32[2,16,256], index: 3, kind: input, shape index: {}]   ;;  %s2245_s4 = inlined_call_operand.vmem [shape: f32[64,64], index: 4, kind: input, shape index: {}]   ;;  %s2246_s5 = inlined_call_operand.vmem [shape: f32[64,64], index: 5, kind: input, shape index: {}]   ;;  %s2247_s6 = inlined_call_operand.vmem [shape: f32[128,64], index: 6, kind: input, shape index: {}]   ;;  %s2248_s7 = inlined_call_operand.vmem [shape: f32[256,64], index: 7, kind: input, shape index: {}]   ;;  %s2249_s8 = inlined_call_operand.vmem [shape: f32[1,64], index: 8, kind: input, shape index: {}]   ;;  %s2250_s9 = inlined_call_operand.hbm [shape: f32[2,16,64], index: 9, kind: output, shape index: {0}]   ;;  %s2251_s10 = inlined_call_operand.hbm [shape: s32[2,1,64], index: 10, kind: output, shape index: {1}]   ;;  %s2252_s11 = inlined_call_operand.hbm [shape: f32[2,1,64], index: 11, kind: output, shape index: {2}]  }
   0x1   :  { %2257 = sst [smem:[#allocation14_spill]] %s2241_s0 }
   0x2   :  { %2258 = sst [smem:[#allocation15_spill]] %s2242_s1 }
   0x3   :  { %17 = vsyncpa [#allocation5], 0 }
   0x4   :  { %19 = vsyncpa [#allocation5 + $0x1], 0 }
   0x5   :  { %20 = vsyncpa [#allocation7], 0 }
   0x6   :  { %22 = vsyncpa [#allocation7 + $0x1], 0  ;;  %s1802_s17 = smov 0   ;;  %s1804_s18 = smov 0  }
   0x7   :  { %s1806_s19 = smov 0   ;;  %s1808_s20 = smov 0  }
   0x8   :  { %s1810_s21 = smov 0   ;;  %s1812_s22 = smov 0  }
   0x9 LB: > { %2259 = sst [smem:[#allocation11_spill]] %s1729_s21  ;;  %s2254_s23 = sadd.s32 4294967295, %s1733_s22   ;;  %s1733_s22 = sphi %s1812_s22, %s28_s22   ;;  %s1729_s21 = sphi %s1810_s21, %s2270_s21   ;;  %s1725_s20 = sphi %s1808_s20, %s2269_s20   ;;  %s1721_s19 = sphi %s1806_s19, %s2273_s19   ;;  %s1717_s18 = sphi %s1804_s18, %s2272_s18   ;;  %s1713_s17 = sphi %s1802_s17, %s2271_s17  }
   0xa   : > { %s2253_s24 = sadd.s32 4294967294, %s1733_s22   ;;  %s40_s25 = sadd.s32 1, %s1729_s21 }
   0xb   : > { %s266_s26 = sadd.s32 1, %s1721_s19  ;;  %p42_p0 = scmp.ge.s32.totalorder %s40_s25, 2 }
   0xc   : > { %p276_p1 = scmp.ne.s32.totalorder %s1721_s19, %s1717_s18  ;;  %p277_p2 = scmp.eq.s32.totalorder %s2254_s23, 1 }
   0xd   : > { %p282_p3 = scmp.ne.s32.totalorder %s1717_s18, %s1713_s17  ;;  %s2275_s25 = smov (%p42_p0, %s40_s25), 0 }
   0xe   : > { %2260 = sst [smem:[#allocation12_spill]] %s2275_s25  ;;  %p1844_p4 = por %p277_p2, %p276_p1 }
   0xf   : > { %p283_p5 = scmp.eq.s32.totalorder %s2253_s24, 1  ;;  %s261_s28 = ssub.s32 %s1729_s21, %s2275_s25 }
  0x10   : > { %p1250_p6 = scmp.ge.s32.totalorder %s1733_s22, 1  ;;  %p264_p7 = scmp.eq.s32.totalorder %s261_s28, 0 }
  0x11   : > { %p1853_p8 = por %p283_p5, %p282_p3  ;;  %p421_p9 = scmp.lt.s32.totalorder %s1733_s22, 3 }
  0x12   : > { %s1859_s30 = scalar_select %p264_p7, %s1721_s19, %s266_s26  }
  0x13   : > { %p422_p10 = pnand %p1250_p6, %p421_p9 }
  0x14   : > { %2263 = sst [smem:[#allocation13_spill]] %s1859_s30  ;;  %v562_v0 = vld [vmem:[%s2246_s5] sm:$0xff] (!%p422_p10)  ;;  %v563_v1 = vld [vmem:[%s2246_s5 + $0x8] sm:$0xff] (!%p422_p10)  ;;  %p502_p11 = scmp.lt.s32.totalorder (!%p422_p10), %s1725_s20, 1  ;;  %v564_v5 = vld [vmem:[%s2246_s5 + $0x10] sm:$0xff] (!%p422_p10)  ;;  %vm570_vm0 = vcmask (!%p422_p10), 523264  }
  0x15   : > { %425 = sbr.rel (%p422_p10) target bundleno = 385 (0x181), region = 56  ;;  %v552_v2 = vld [vmem:[%s2245_s4] sm:$0xff] (!%p422_p10)  ;;  %v1426_v3 = vpack.c.bf16 (!%p422_p10), %v563_v1, %v562_v0  ;;  %v553_v4 = vld [vmem:[%s2245_s4 + $0x8] sm:$0xff] (!%p422_p10)  ;;  %v565_v6 = vld [vmem:[%s2246_s5 + $0x18] sm:$0xff] (!%p422_p10)  ;;  %s2264_s1 = sld [smem:[#allocation15_spill]] (!%p422_p10)  ;;  %vm547_vm1 = vcmask (!%p422_p10), 516096  }
  0x16   : > { %v1442_v7 = vpack.c.bf16 (!%p422_p10), %v553_v4, %v552_v2  ;;  %v1430_v8 = vpack.c.bf16 (!%p422_p10), %v565_v6, %v564_v5  ;;  %v554_v9 = vld [vmem:[%s2245_s4 + $0x10] sm:$0xff] (!%p422_p10)  ;;  %v555_v10 = vld [vmem:[%s2245_s4 + $0x18] sm:$0xff] (!%p422_p10)  ;;  %v566_v11 = vld [vmem:[%s2246_s5 + $0x20] sm:$0xff] (!%p422_p10)  ;;  %s2265_s0 = sld [smem:[#allocation14_spill]] (!%p422_p10) }
  0x17   : > { %1427 = vmatprep.subr.bf16.mxu1 (!%p422_p10), %v1426_v3  ;;  %v1446_v12 = vpack.c.bf16 (!%p422_p10), %v555_v10, %v554_v9  ;;  %v567_v13 = vld [vmem:[%s2246_s5 + $0x28] sm:$0xff] (!%p422_p10)  ;;  %v556_v14 = vld [vmem:[%s2245_s4 + $0x20] sm:$0xff] (!%p422_p10)  ;;  %v568_v17 = vld [vmem:[%s2246_s5 + $0x30] sm:$0xff] (!%p422_p10) }
  0x18   : > { %v557_v15 = vld [vmem:[%s2245_s4 + $0x28] sm:$0xff] (!%p422_p10)  ;;  %1443 = vmatprep.subr.bf16.mxu0 (!%p422_p10), %v1442_v7  ;;  %1429 = vmatpush3.bf16.msra.mxu1 (!%p422_p10), %v1426_v3  ;;  %v1434_v16 = vpack.c.bf16 (!%p422_p10), %v567_v13, %v566_v11  ;;  %v569_v19 = vld [vmem:[%s2246_s5 + $0x38] sm:$0xff] (!%p422_p10)  ;;  %v558_v22 = vld [vmem:[%s2245_s4 + $0x30] sm:$0xff] (!%p422_p10) }
  0x19   : > { %1445 = vmatpush3.bf16.msra.mxu0 (!%p422_p10), %v1442_v7  ;;  %1431 = vmatprep.subr.bf16.mxu1 (!%p422_p10), %v1430_v8  ;;  %v1450_v18 = vpack.c.bf16 (!%p422_p10), %v557_v15, %v556_v14  ;;  %v559_v23 = vld [vmem:[%s2245_s4 + $0x38] sm:$0xff] (!%p422_p10)  ;;  %v1438_v24 = vpack.c.bf16 (!%p422_p10), %v569_v19, %v568_v17  ;;  %v848_v26 = vld [vmem:[%s2248_s7 + $0x80] sm:$0xff] (!%p422_p10)  ;;  %v849_v27 = vld [vmem:[%s2248_s7 + $0x88] sm:$0xff] (!%p422_p10) }
  0x1a   : > { %1447 = vmatprep.subr.bf16.mxu0 (!%p422_p10), %v1446_v12  ;;  %v1454_v25 = vpack.c.bf16 (!%p422_p10), %v559_v23, %v558_v22  ;;  %v735_v28 = vld [vmem:[%s2247_s6] sm:$0xff] (!%p422_p10)  ;;  %v736_v29 = vld [vmem:[%s2247_s6 + $0x8] sm:$0xff] (!%p422_p10)  ;;  %v1490_v30 = vpack.c.bf16 (!%p422_p10), %v849_v27, %v848_v26  ;;  %v850_v34 = vld [vmem:[%s2248_s7 + $0x90] sm:$0xff] (!%p422_p10) }
  0x1b   : > { %v832_v31 = vld [vmem:[%s2248_s7] sm:$0xff] (!%p422_p10)  ;;  %v833_v32 = vld [vmem:[%s2248_s7 + $0x8] sm:$0xff] (!%p422_p10)  ;;  %v1458_v33 = vpack.c.bf16 (!%p422_p10), %v736_v29, %v735_v28  ;;  %v851_v35 = vld [vmem:[%s2248_s7 + $0x98] sm:$0xff] (!%p422_p10) }
  0x1c   : > { %s1890_s23 = scalar_select %p502_p11, %s1725_s20, 1  ;;  %1433 = vmatpush3.bf16.msra.mxu1 %v1430_v8  ;;  %v737_v36 = vld [vmem:[%s2247_s6 + $0x10] sm:$0xff]  ;;  %v738_v37 = vld [vmem:[%s2247_s6 + $0x18] sm:$0xff]  ;;  %v1492_v39 = vpack.c.bf16 %v833_v32, %v832_v31  ;;  %v1494_v41 = vpack.c.bf16 %v851_v35, %v850_v34  ;;  %v852_v45 = vld [vmem:[%s2248_s7 + $0xa0] sm:$0xff] }
  0x1d   : > { %1449 = vmatpush3.bf16.msra.mxu0 %v1446_v12  ;;  %1435 = vmatprep.subr.bf16.mxu1 %v1434_v16  ;;  %v834_v42 = vld [vmem:[%s2248_s7 + $0x10] sm:$0xff]  ;;  %v835_v43 = vld [vmem:[%s2248_s7 + $0x18] sm:$0xff]  ;;  %v1462_v44 = vpack.c.bf16 %v738_v37, %v737_v36  ;;  %v853_v46 = vld [vmem:[%s2248_s7 + $0xa8] sm:$0xff] }
  0x1e   : > { %s1902_s28 = sshll.u32 %s1890_s23, 4  ;;  %1451 = vmatprep.subr.bf16.mxu0 %v1450_v18  ;;  %v739_v47 = vld [vmem:[%s2247_s6 + $0x20] sm:$0xff]  ;;  %v740_v48 = vld [vmem:[%s2247_s6 + $0x28] sm:$0xff]  ;;  %v1496_v49 = vpack.c.bf16 %v835_v43, %v834_v42  ;;  %v1498_v50 = vpack.c.bf16 %v853_v46, %v852_v45  ;;  %v854_v54 = vld [vmem:[%s2248_s7 + $0xb0] sm:$0xff]  ;;  %v1735_v42 = vmov -inf   ;;  %v1736_v43 = vmov 0  }
  0x1f   : > { %s1911_s13 = scalar_lea.vmem %s2264_s1, %s1902_s28  ;;  %s1917_s16 = scalar_lea.vmem %s2265_s0, %s1902_s28  ;;  %v836_v51 = vld [vmem:[%s2248_s7 + $0x20] sm:$0xff]  ;;  %v837_v52 = vld [vmem:[%s2248_s7 + $0x28] sm:$0xff]  ;;  %v1466_v53 = vpack.c.bf16 %v740_v48, %v739_v47  ;;  %v855_v55 = vld [vmem:[%s2248_s7 + $0xb8] sm:$0xff]  ;;  %548 = vst.msk [vmem:[#allocation2] sm:$0x1] %vm547_vm1, %v1735_v42 }
  0x20   : > { %v560_v20 = vld [vmem:[%s1911_s13] sm:$0xff]  ;;  %1437 = vmatpush3.bf16.msra.mxu1 %v1434_v16  ;;  %v561_v38 = vld [vmem:[%s1911_s13 + $0x8] sm:$0xff]  ;;  %s1275_s0 = sshll.u32 %s1890_s23, 5  ;;  %s1988_s24 = scalar_lea.vmem %s2243_s2, %s1902_s28  ;;  %v741_v57 = vld [vmem:[%s2247_s6 + $0x30] sm:$0xff]  ;;  %v1500_v60 = vpack.c.bf16 %v837_v52, %v836_v51  ;;  %v1502_v61 = vpack.c.bf16 %v855_v55, %v854_v54  ;;  %549 = vst.msk [vmem:[#allocation3] sm:$0x1] %vm547_vm1, %v1736_v43 }
  0x21   : > { %v550_v21 = vld [vmem:[%s1917_s16] sm:$0xff]  ;;  %1369 = vmatprep.mubr.msk.f32.mxu1 %vm570_vm0, %v560_v20  ;;  %1453 = vmatpush3.bf16.msra.mxu0 %v1450_v18  ;;  %v551_v40 = vld [vmem:[%s1917_s16 + $0x8] sm:$0xff]  ;;  %s1994_s25 = scalar_lea.vmem %s2244_s3, %s1275_s0  ;;  %v742_v58 = vld [vmem:[%s2247_s6 + $0x38] sm:$0xff]  ;;  %s1276_s0 = sshll.u32 %s1725_s20, 8 }
  0x22   : > { %1388 = vmatprep.mubr.msk.f32.mxu0 %vm570_vm0, %v550_v21  ;;  %1439 = vmatprep.subr.bf16.mxu1 %v1438_v24  ;;  %v733_v56 = vld [vmem:[%s1988_s24] sm:$0xff]  ;;  %v829_v59 = vld [vmem:[%s1994_s25 + $0x8] sm:$0xff]  ;;  %v838_v62 = vld [vmem:[%s2248_s7 + $0x30] sm:$0xff]  ;;  %v1470_v0 = vpack.c.bf16 %v742_v58, %v741_v57  ;;  %s2112_s1 = scalar_lea.hbm %s2250_s9, %s1276_s0  ;;  %s1737_s28 = smov [#allocation4]  }
  0x23   : > { %1455 = vmatprep.subr.bf16.mxu0 %v1454_v25  ;;  %v839_v63 = vld [vmem:[%s2248_s7 + $0x38] sm:$0xff]  ;;  %v856_v1 = vld [vmem:[%s2248_s7 + $0xc0] sm:$0xff]  ;;  %v857_v2 = vld [vmem:[%s2248_s7 + $0xc8] sm:$0xff]  ;;  %s1599_s16 = sshll.u32 %s1737_s28, 4  ;;  %s1600_s16 = int_to_ptr.vmem [resolvable:$false] %s1599_s16 }
  0x24   : > { %1441 = vmatpush3.bf16.msra.mxu1 %v1438_v24  ;;  %v743_v3 = vld [vmem:[%s2247_s6 + $0x40] sm:$0xff]  ;;  %v744_v4 = vld [vmem:[%s2247_s6 + $0x48] sm:$0xff]  ;;  %v1504_v5 = vpack.c.bf16 %v839_v63, %v838_v62  ;;  %v1506_v6 = vpack.c.bf16 %v857_v2, %v856_v1  ;;  %v858_v10 = vld [vmem:[%s2248_s7 + $0xd0] sm:$0xff] }
  0x25   : > { %1457 = vmatpush3.bf16.msra.mxu0 %v1454_v25  ;;  %1491 = vmatprep.subr.bf16.mxu1 %v1490_v30  ;;  %v840_v7 = vld [vmem:[%s2248_s7 + $0x40] sm:$0xff]  ;;  %v841_v8 = vld [vmem:[%s2248_s7 + $0x48] sm:$0xff]  ;;  %v1474_v9 = vpack.c.bf16 %v744_v4, %v743_v3  ;;  %v859_v11 = vld [vmem:[%s2248_s7 + $0xd8] sm:$0xff] }
  0x26   : > { %1459 = vmatprep.subr.bf16.mxu0 %v1458_v33  ;;  %v745_v12 = vld [vmem:[%s2247_s6 + $0x50] sm:$0xff]  ;;  %v746_v13 = vld [vmem:[%s2247_s6 + $0x58] sm:$0xff]  ;;  %v1508_v14 = vpack.c.bf16 %v841_v8, %v840_v7  ;;  %v1510_v15 = vpack.c.bf16 %v859_v11, %v858_v10  ;;  %v860_v19 = vld [vmem:[%s2248_s7 + $0xe0] sm:$0xff] }
  0x27   : > { %1370 = vmatmul.mubr.msk.f32.vlgmr.msra.gmra.mrb[0].mxu1 %vm570_vm0, %v561_v38  ;;  %v842_v16 = vld [vmem:[%s2248_s7 + $0x50] sm:$0xff]  ;;  %v843_v17 = vld [vmem:[%s2248_s7 + $0x58] sm:$0xff]  ;;  %v1478_v18 = vpack.c.bf16 %v746_v13, %v745_v12  ;;  %v861_v20 = vld [vmem:[%s2248_s7 + $0xe8] sm:$0xff] }
  0x28   : > { %1389 = vmatmul.mubr.msk.f32.vlgmr.msra.gmra.mrb[0].mxu0 %vm570_vm0, %v551_v40  ;;  %1493 = vmatpush3.bf16.msra.mxu1 %v1492_v39  ;;  %v747_v21 = vld [vmem:[%s2247_s6 + $0x60] sm:$0xff]  ;;  %v748_v22 = vld [vmem:[%s2247_s6 + $0x68] sm:$0xff]  ;;  %v1512_v23 = vpack.c.bf16 %v843_v17, %v842_v16  ;;  %v1514_v24 = vpack.c.bf16 %v861_v20, %v860_v19  ;;  %v862_v28 = vld [vmem:[%s2248_s7 + $0xf0] sm:$0xff] }
  0x29   : > { %1461 = vmatpush3.bf16.msra.mxu0 %v1458_v33  ;;  %1495 = vmatprep.subr.bf16.mxu1 %v1494_v41  ;;  %v844_v25 = vld [vmem:[%s2248_s7 + $0x60] sm:$0xff]  ;;  %v845_v26 = vld [vmem:[%s2248_s7 + $0x68] sm:$0xff]  ;;  %v1482_v27 = vpack.c.bf16 %v748_v22, %v747_v21  ;;  %v863_v29 = vld [vmem:[%s2248_s7 + $0xf8] sm:$0xff] }
  0x2a   : > { %1463 = vmatprep.subr.bf16.mxu0 %v1462_v44  ;;  %1423 = vmatprep.mubr.f32.mxu0 %v733_v56  ;;  %v749_v30 = vld [vmem:[%s2247_s6 + $0x70] sm:$0xff]  ;;  %v750_v31 = vld [vmem:[%s2247_s6 + $0x78] sm:$0xff]  ;;  %v1516_v32 = vpack.c.bf16 %v845_v26, %v844_v25  ;;  %v1518_v33 = vpack.c.bf16 %v863_v29, %v862_v28  ;;  %v828_v38 = vld [vmem:[%s1994_s25] sm:$0xff] }
  0x2b   : > { %928 = vmatprep.mubr.f32.mxu1 %v829_v59  ;;  %v846_v34 = vld [vmem:[%s2248_s7 + $0x70] sm:$0xff]  ;;  %v847_v35 = vld [vmem:[%s2248_s7 + $0x78] sm:$0xff]  ;;  %v1486_v36 = vpack.c.bf16 %v750_v31, %v749_v30  ;;  %v734_v39 = vld [vmem:[%s1988_s24 + $0x8] sm:$0xff]  ;;  %s2101_s24 = sand.u32 1, %s1717_s18  }
  0x2c   : > { %1497 = vmatpush3.bf16.msra.mxu1 %v1496_v49  ;;  %v1520_v37 = vpack.c.bf16 %v847_v35, %v846_v34  ;;  %v831_v40 = vld [vmem:[%s1994_s25 + $0x18] sm:$0xff]  ;;  %v830_v41 = vld [vmem:[%s1994_s25 + $0x10] sm:$0xff]  ;;  %s1251_s30 = sshll.u32 %s2101_s24, 4  ;;  %s1008_s13 = scalar_lea.sflag [#allocation5], %s2101_s24 }
  0x2d   : > { %1465 = vmatpush3.bf16.msra.mxu0 %v1462_v44  ;;  %1499 = vmatprep.subr.bf16.mxu1 %v1498_v50  ;;  %s488_s14 = scalar_lea.vmem [#allocation4], %s1251_s30  ;;  %s1601_s25 = scalar_lea.vmem %s1600_s16, 512 }
  0x2e   : > { %1467 = vmatprep.subr.bf16.mxu0 %v1466_v53  ;;  %s1031_s23 = sshll.u32 %s488_s14, 4  ;;  %s2114_s23 = int_to_ptr.vmem [resolvable:$true] %s1031_s23 }
  0x2f   : > { %s1595_s12 = scalar_lea.vmem %s2114_s23, 256  ;;  %p1602_p1 = scmp.lt.s32.totalorder %s2114_s23, %s1600_s16 }
  0x30   : > { %1501 = vmatpush3.bf16.msra.mxu1 %v1500_v60  ;;  %p1596_p12 = scmp.ne.s32.totalorder %s2114_s23, %s1595_s12  ;;  %p1603_p2 = scmp.lt.s32.totalorder %s1601_s25, %s1595_s12 }
  0x31   : > { %1469 = vmatpush3.bf16.msra.mxu0 %v1466_v53  ;;  %1503 = vmatprep.subr.bf16.mxu1 %v1502_v61  ;;  %v1264_v53 = vld [vmem:[%s2249_s8] ss:$0 sm:$0xff] }
  0x32   : > { %1471 = vmatprep.subr.bf16.mxu0 %v1470_v0  ;;  %p1597_p13 = pnand %p1596_p12, %p1844_p4  ;;  %p1604_p3 = por %p1603_p2, %p1602_p1 }
  0x34   : > { %1505 = vmatpush3.bf16.msra.mxu1 %v1504_v5  ;;  %p1598_p0 = pneg %p1597_p13 }
  0x35   : > { %1473 = vmatpush3.bf16.msra.mxu0 %v1470_v0  ;;  %1507 = vmatprep.subr.bf16.mxu1 %v1506_v6 }
  0x36   : > { %1475 = vmatprep.subr.bf16.mxu0 %v1474_v9  ;;  %p1605_p5 = pnand %p1604_p3, %p1598_p0 }
  0x38   : > { %1509 = vmatpush3.bf16.msra.mxu1 %v1508_v14 }
  0x39   : > { %1477 = vmatpush3.bf16.msra.mxu0 %v1474_v9  ;;  %1511 = vmatprep.subr.bf16.mxu1 %v1510_v15 }
  0x3a   : > { %1479 = vmatprep.subr.bf16.mxu0 %v1478_v18 }
  0x3c   : > { %1513 = vmatpush3.bf16.msra.mxu1 %v1512_v23 }
  0x3d   : > { %1481 = vmatpush3.bf16.msra.mxu0 %v1478_v18  ;;  %1515 = vmatprep.subr.bf16.mxu1 %v1514_v24 }
  0x3e   : > { %1483 = vmatprep.subr.bf16.mxu0 %v1482_v27 }
  0x40   : > { %1517 = vmatpush3.bf16.msra.mxu1 %v1516_v32 }
  0x41   : > { %1485 = vmatpush3.bf16.msra.mxu0 %v1482_v27  ;;  %1519 = vmatprep.subr.bf16.mxu1 %v1518_v33 }
  0x42   : > { %1487 = vmatprep.subr.bf16.mxu0 %v1486_v36 }
  0x44   : > { %1521 = vmatpush3.bf16.msra.mxu1 %v1520_v37 }
  0x45   : > { %1489 = vmatpush3.bf16.msra.mxu0 %v1486_v36 }
  0x47   : > { %929 = vmatmul.mubr.f32.vlgmr.msra.gmra.mrb[2].mxu1 %v828_v38 }
  0x48   : > { %1424 = vmatmul.mubr.f32.vlgmr.msra.gmra.mrb[0].mxu0 %v734_v39  ;;  %933 = vmatprep.mubr.f32.mxu1 %v831_v40 }
  0x4b   : > { %934 = vmatmul.mubr.f32.gmra.mrb[4].mxu1 %v830_v41 }
  0xfa   : > { %v1371_v44 = vpop.f32.mrb[0].mxu1 }
  0xfb   : > { %v643_v45 = vpop.f32.mrb[1].mxu1 }
 0x11a   : > { %v1347_v46 = vpop.f32.mrb[2].mxu1 }
 0x11b   : > { %v1425_v47 = vpop.f32.mrb[0].mxu0  ;;  %v1348_v48 = vpop.f32.mrb[3].mxu1 }
 0x11c   : > { %v1522_v49 = vadd.f32 %v1425_v47, %v1371_v44  ;;  %v817_v50 = vpop.f32.mrb[1].mxu0  ;;  %v1349_v51 = vadd.f32 %v1348_v48, %v1347_v46 }
 0x11d   : > { %v1523_v52 = vadd.f32 %v817_v50, %v643_v45 }
 0x11e   : > { %v1350_v54 = vpop.f32.mrb[4].mxu1 }
 0x11f   : > { %v939_v55 = vadd.f32 %v1523_v52, %v1349_v51  ;;  %v1351_v56 = vpop.f32.mrb[5].mxu1 }
 0x120   : > { %v1352_v57 = vadd.f32 %v1351_v56, %v1350_v54 }
 0x121   : > { %v948_v58 = vadd.f32 %v1264_v53, %v939_v55 }
 0x122   : > { %v940_v59 = vadd.f32 %v1522_v49, %v1352_v57 }
 0x123   : > { %vm950_vm2 = vcmp.gt.f32.partialorder %v948_v58, 0.0  ;;  %v952_v60 = vmul.f32 0.2, %v948_v58 }
 0x124   : > { %v949_v61 = vadd.f32 %v1264_v53, %v940_v59 }
 0x125   : > { %v954_v62 = vsel %vm950_vm2, %v948_v58, %v952_v60 }
 0x126   : > { %vm951_vm3 = vcmp.gt.f32.partialorder %v949_v61, 0.0  ;;  %v953_v63 = vmul.f32 0.2, %v949_v61  ;;  %956 = vst.msk [vmem:[%s488_s14] sm:$0xff] %vm570_vm0, %v954_v62  ;;  %v958_v1 = vsel %vm570_vm0, %v954_v62, -inf }
 0x128   : > { %v955_v0 = vsel %vm951_vm3, %v949_v61, %v953_v63 }
 0x129   : > { %v959_v2 = vsel %vm570_vm0, %v955_v0, -inf  ;;  %957 = vst.msk [vmem:[%s488_s14 + $0x8] sm:$0xff] %vm570_vm0, %v955_v0 }
 0x12a   : > { %v960_v3 = vmax.f32 %v958_v1, %v959_v2 }
 0x12b   : > { %1608 = shalt.err (!%p1605_p5)
}
 0x12c   : > { %s1609_s21 = scalar_lea.hbm %s2112_s1, 256  ;;  %s1613_s14 = scalar_lea.hbm %s2250_s9, 512 }
 0x12d   : > { %p1610_p6 = scmp.ne.s32.totalorder %s2112_s1, %s1609_s21  ;;  %p1614_p10 = scmp.lt.u32.totalorder %s2112_s1, %s2250_s9 }
 0x12e   : > { %p1615_p11 = scmp.lt.u32.totalorder %s1613_s14, %s1609_s21  ;;  %p1617_p13 = scmp.lt.u32.totalorder %s1609_s21, %s2112_s1 }
 0x12f   : > { %p1611_p7 = pnand %p1610_p6, %p1844_p4 }
 0x130   : > { %p1616_p12 = por %p1615_p11, %p1614_p10 }
 0x131   : > { %p1612_p9 = pneg %p1611_p7 }
 0x132   : > { %p1618_p0 = por %p1617_p13, %p1616_p12 }
 0x134   : > { %p1619_p1 = pnand %p1618_p0, %p1612_p9 }
 0x136   : > { %1622 = shalt.err (!%p1619_p1)
}
 0x137   : > { %s1738_s12 = smov 128   ;;  %s1739_s28 = smov 8   ;;  %v961_v4 = vrot.slane %v960_v3, 4  ;;  %v967_v5 = vlaneseq  ;;  %v997_v12 = vld [vmem:[#allocation2] sm:$0x1] }
 0x138   : > { %1526 = dma.vmem_to_hbm [thread:$0]  (%p1844_p4), %s2114_s23, 256, %s2112_s1, %s1008_s13, %s1738_s12, %s1738_s12, %s1739_s28   ;;  %v991_v17 = vld [vmem:[#allocation2] sm:$0x1]  ;;  %v993_v27 = vld [vmem:[#allocation3] sm:$0x1] }
 0x139   : > { %v962_v6 = vmax.f32 %v960_v3, %v961_v4  ;;  %v968_v8 = vshrl.u32 %v967_v5, 7  ;;  %s500_s23 = scalar_lea.vmem [#allocation8], %s2101_s24  ;;  %s2266_s1 = sadd.s32 4294967295, %s1733_s22  }
 0x13a   : > { %s2151_s13 = sand.u32 1, %s2266_s1   ;;  %s1268_s16 = sshll.u32 %s1725_s20, 4 }
 0x13b   : > { %v963_v7 = vrot.slane %v962_v6, 2  ;;  %v969_v11 = vadd.s32 8, %v968_v8  ;;  %s494_s25 = scalar_lea.vmem [#allocation6], %s2101_s24  ;;  %s1060_s30 = sshll.u32 %s500_s23, 4  ;;  %s2167_s30 = int_to_ptr.vmem [resolvable:$true] %s1060_s30 }
 0x13c   : > { %s1047_s21 = sshll.u32 %s494_s25, 4  ;;  %s2158_s15 = scalar_lea.hbm %s2251_s10, %s1268_s16  ;;  %s2160_s21 = int_to_ptr.vmem [resolvable:$true] %s1047_s21 }
 0x13d   : > { %v964_v9 = vmax.f32 %v962_v6, %v963_v7  ;;  %s2165_s28 = scalar_lea.hbm %s2252_s11, %s1268_s16  ;;  %s1013_s20 = scalar_lea.sflag [#allocation7], %s2151_s13 }
 0x13e   : > { %s1623_s24 = scalar_lea.vmem %s2160_s21, 16 }
 0x13f   : > { %v965_v10 = vrot.slane %v964_v9, 1  ;;  %p1624_p2 = scmp.ne.s32.totalorder %s2160_s21, %s1623_s24 }
 0x141   : > { %v966_v13 = vmax.f32 %v964_v9, %v965_v10  ;;  %p1625_p3 = pnand %p1624_p2, %p1844_p4 }
 0x143   : > { %vm974_vm4 = vcmp.eq.f32.partialorder %v954_v62, %v966_v13  ;;  %vm975_vm5 = vcmp.eq.f32.partialorder %v955_v0, %v966_v13  ;;  %v998_v14 = vmax.f32 %v997_v12, %v966_v13  ;;  %vm992_vm10 = vcmp.gt.f32.partialorder %v966_v13, %v991_v17  ;;  %p1626_p5 = pneg %p1625_p3 }
 0x144   : > { %v976_v15 = vsel %vm974_vm4, %v968_v8, 1073741824  ;;  %v977_v16 = vsel %vm975_vm5, %v969_v11, 1073741824 }
 0x145   : > { %v978_v18 = vsel %vm570_vm0, %v976_v15, 2147483647  ;;  %v979_v19 = vsel %vm570_vm0, %v977_v16, 2147483647  ;;  %999 = vst.msk [vmem:[#allocation2] sm:$0x1] %vm547_vm1, %v998_v14 }
 0x146   : > { %vm980_vm6 = vcmp.lt.s32.totalorder %v978_v18, %v979_v19 }
 0x147   : > { %v981_v20 = vsel %vm980_vm6, %v978_v18, %v979_v19 }
 0x148   : > { %v982_v21 = vrot.slane %v981_v20, 4 }
 0x14a   : > { %vm983_vm7 = vcmp.lt.s32.totalorder %v981_v20, %v982_v21 }
 0x14b   : > { %v984_v22 = vsel %vm983_vm7, %v981_v20, %v982_v21 }
 0x14c   : > { %v985_v23 = vrot.slane %v984_v22, 2  ;;  %v1003_v24 = vld [vmem:[#allocation2] sm:$0x1] }
 0x14d   : > { %1004 = vst.msk [vmem:[%s500_s23] sm:$0x1] %vm547_vm1, %v1003_v24  ;;  %s1740_s23 = smov [#allocation6]  }
 0x14e   : > { %vm986_vm8 = vcmp.lt.s32.totalorder %v984_v22, %v985_v23  ;;  %s1627_s1 = sshll.u32 %s1740_s23, 4  ;;  %s1628_s1 = int_to_ptr.vmem [resolvable:$false] %s1627_s1 }
 0x14f   : > { %v987_v25 = vsel %vm986_vm8, %v984_v22, %v985_v23  ;;  %s1629_s0 = scalar_lea.vmem %s1628_s1, 32  ;;  %p1630_p6 = scmp.lt.s32.totalorder %s2160_s21, %s1628_s1 }
 0x150   : > { %v988_v26 = vrot.slane %v987_v25, 1  ;;  %p1631_p7 = scmp.lt.s32.totalorder %s1629_s0, %s1623_s24 }
 0x152   : > { %vm989_vm9 = vcmp.lt.s32.totalorder %v987_v25, %v988_v26  ;;  %p1632_p9 = por %p1631_p7, %p1630_p6 }
 0x153   : > { %v990_v28 = vsel %vm989_vm9, %v987_v25, %v988_v26 }
 0x154   : > { %v994_v29 = vsel %vm992_vm10, %v990_v28, %v993_v27  ;;  %p1633_p10 = pnand %p1632_p9, %p1626_p5 }
 0x155   : > { %996 = vst.msk [vmem:[#allocation3] sm:$0x1] %vm547_vm1, %v994_v29 }
 0x15c   : > { %v1005_v30 = vld [vmem:[#allocation3] sm:$0x1] }
 0x15d   : > { %1006 = vst.msk [vmem:[%s494_s25] sm:$0x1] %vm547_vm1, %v1005_v30 }
 0x15e   : > { %1636 = shalt.err (!%p1633_p10)
}
 0x15f   : > { %s1637_s16 = scalar_lea.hbm %s2158_s15, 16  ;;  %s1641_s26 = scalar_lea.hbm %s2251_s10, 32 }
 0x160   : > { %p1638_p11 = scmp.ne.s32.totalorder %s2158_s15, %s1637_s16  ;;  %p1642_p0 = scmp.lt.u32.totalorder %s2158_s15, %s2251_s10 }
 0x161   : > { %p1643_p1 = scmp.lt.u32.totalorder %s1641_s26, %s1637_s16  ;;  %p1645_p3 = scmp.lt.u32.totalorder %s1637_s16, %s2158_s15 }
 0x162   : > { %p1639_p12 = pnand %p1638_p11, %p1844_p4 }
 0x163   : > { %p1644_p2 = por %p1643_p1, %p1642_p0 }
 0x164   : > { %p1640_p13 = pneg %p1639_p12 }
 0x165   : > { %p1646_p5 = por %p1645_p3, %p1644_p2 }
 0x167   : > { %p1647_p6 = pnand %p1646_p5, %p1640_p13 }
 0x169   : > { %1650 = shalt.err (!%p1647_p6)
}
 0x16a   : > { %1527 = dma.vmem_to_hbm [thread:$0]  (%p1844_p4), %s2160_s21, 16, %s2158_s15, %s1013_s20  }
 0x16b   : > { %s1651_s24 = scalar_lea.vmem %s2167_s30, 16  ;;  %s1741_s1 = smov [#allocation8]  }
 0x16c   : > { %p1652_p7 = scmp.ne.s32.totalorder %s2167_s30, %s1651_s24  ;;  %s1655_s0 = sshll.u32 %s1741_s1, 4  ;;  %s1656_s0 = int_to_ptr.vmem [resolvable:$false] %s1655_s0 }
 0x16d   : > { %s1657_s16 = scalar_lea.vmem %s1656_s0, 32  ;;  %p1658_p11 = scmp.lt.s32.totalorder %s2167_s30, %s1656_s0 }
 0x16e   : > { %p1653_p9 = pnand %p1652_p7, %p1844_p4  ;;  %p1659_p12 = scmp.lt.s32.totalorder %s1657_s16, %s1651_s24 }
 0x170   : > { %p1654_p10 = pneg %p1653_p9  ;;  %p1660_p13 = por %p1659_p12, %p1658_p11 }
 0x172   : > { %p1661_p0 = pnand %p1660_p13, %p1654_p10 }
 0x174   : > { %1664 = shalt.err (!%p1661_p0)
}
 0x175   : > { %s1665_s21 = scalar_lea.hbm %s2165_s28, 16  ;;  %s1669_s14 = scalar_lea.hbm %s2252_s11, 32 }
 0x176   : > { %p1666_p1 = scmp.ne.s32.totalorder %s2165_s28, %s1665_s21  ;;  %p1670_p5 = scmp.lt.u32.totalorder %s2165_s28, %s2252_s11 }
 0x177   : > { %p1671_p6 = scmp.lt.u32.totalorder %s1669_s14, %s1665_s21  ;;  %p1673_p9 = scmp.lt.u32.totalorder %s1665_s21, %s2165_s28 }
 0x178   : > { %p1667_p2 = pnand %p1666_p1, %p1844_p4 }
 0x179   : > { %p1672_p7 = por %p1671_p6, %p1670_p5 }
 0x17a   : > { %p1668_p3 = pneg %p1667_p2 }
 0x17b   : > { %p1674_p10 = por %p1673_p9, %p1672_p7 }
 0x17d   : > { %p1675_p11 = pnand %p1674_p10, %p1668_p3 }
 0x17f   : > { %1678 = shalt.err (!%p1675_p11)
}
 0x180   : > { %1528 = dma.vmem_to_hbm [thread:$0]  (%p1844_p4), %s2167_s30, 16, %s2165_s28, %s1013_s20  }
 0x181 PF: > { %p1542_p12 = scmp.ge.s32.totalorder %s1733_s22, 2  ;;  %s1072_s23 = sand.u32 1, %s1713_s17  }
 0x182   : > { %s1073_s24 = scalar_lea.sflag [#allocation5], %s1072_s23 }
 0x183   : > { %p1533_p13 = pnand %p1542_p12, %p1853_p8 }
 0x185   : > { %1704 = dma.done.wait (!%p1533_p13), %s1073_s24, 256  }
 0x186   : > { %1706 = vsyncadd (!%p1533_p13), %s1073_s24, 4294967040  ;;  %s2267_s1 = sadd.s32 4294967294, %s1733_s22  }
 0x187   : > { %s1081_s0 = sand.u32 1, %s2267_s1  }
 0x188   : > { %s1082_s27 = scalar_lea.sflag [#allocation7], %s1081_s0 }
 0x189   : > { %1708 = dma.done.wait (!%p1533_p13), %s1082_s27, 32  }
 0x18a   : > { %1710 = vsyncadd (!%p1533_p13), %s1082_s27, 4294967264  ;;  %s28_s22 = sadd.s32 1, %s1733_s22   ;;  %s2268_s13 = sld [smem:[#allocation13_spill]] }
 0x18b   : > { %p25_p4 = scmp.ge.s32.totalorder %s28_s22, 4   ;;  %s2269_s20 = sld [smem:[#allocation11_spill]] }
 0x18c   : > { %s2270_s21 = sld [smem:[#allocation12_spill]]  ;;  %s2271_s17 = smov %s1717_s18 }
 0x18d   : > { %s2272_s18 = smov %s1721_s19  ;;  %27 = sbr.rel (!%p25_p4) target bundleno = 9 (0x9), region = 140 }
 0x190   : > { %s2273_s19 = smov %s2268_s13 }
 0x194   :  { %1094 = vsyncpa [#allocation5], 1 }
 0x195   :  { %1096 = vsyncpa [#allocation5 + $0x1], 1 }
 0x196   :  { %1097 = vsyncpa [#allocation7], 1 }
 0x197   :  { %1099 = vsyncpa [#allocation7 + $0x1], 1 }

</bundles_post_ra>
